<compile_context>
chip_gen: v7x
topology: tpu7x:2x2x1
jax: 0.10.0
libtpu: 0.0.40
codegen_flags: <defaults>
</compile_context>

<pallas_src>
import math
from functools import partial

import jax
import jax.numpy as jnp
from jax import lax
from jax.experimental import pallas as pl
from jax.experimental.pallas import tpu as pltpu


def _layer_norm(x, g, b, eps=1e-5):
    # torch.nn.LayerNorm: biased variance over last dim
    mu = jnp.mean(x, axis=-1, keepdims=True)
    var = jnp.mean((x - mu) ** 2, axis=-1, keepdims=True)
    return (x - mu) * lax.rsqrt(var + eps) * g + b


def _gelu_exact(x):
    # F.gelu default: exact erf formulation
    return 0.5 * x * (1.0 + lax.erf(x * (1.0 / math.sqrt(2.0))))


def transformer_block_kernel(bias_ref, x_ref,
                             ln1g_ref, ln1b_ref, wqkv_ref, wout_ref,
                             ln2g_ref, ln2b_ref, w1_ref, b1_ref, w2_ref, b2_ref,
                             out_ref, *, n_heads, head_size):
    l = pl.program_id(1)
    H = n_heads * head_size

    # Seed the residual stream at the first layer; the out block is resident
    # across the 'arbitrary' layer axis and carries x between layers.
    @pl.when(l == 0)
    def _():
        out_ref[...] = x_ref[...]

    Bt, N, _ = out_ref.shape
    rows = Bt * N
    x2 = out_ref[...].reshape(rows, H)           # (Bt*N, H) f32 residual stream

    # ------------------- attention sub-layer (pre-norm) ----------------------
    h_ln = _layer_norm(x2, ln1g_ref[0, 0], ln1b_ref[0, 0])
    qkv = jnp.dot(h_ln.astype(jnp.bfloat16), wqkv_ref[0],
                  preferred_element_type=jnp.float32)            # (rows, 3H) f32

    def to_heads(t):  # (rows, H) -> (Bt*h, N, d); 1/sqrt(d) already in W_q
        return (t.reshape(Bt, N, n_heads, head_size)
                 .transpose(0, 2, 1, 3)
                 .reshape(Bt * n_heads, N, head_size))

    q3 = to_heads(qkv[:, 0:H])
    k3 = to_heads(qkv[:, H:2 * H])
    v3 = to_heads(qkv[:, 2 * H:3 * H])

    s = jnp.einsum("gnd,gmd->gnm",
                   q3.astype(jnp.bfloat16), k3.astype(jnp.bfloat16),
                   preferred_element_type=jnp.float32)           # (Bt*h, N, N)
    s = s + bias_ref[...]                                        # additive mask bias
    s = s - jnp.max(s, axis=-1, keepdims=True)                   # stable softmax
    p = jnp.exp(s)
    p = p * pl.reciprocal(jnp.sum(p, axis=-1, keepdims=True), approx=True)

    o = jnp.einsum("gnm,gmd->gnd",
                   p.astype(jnp.bfloat16), v3.astype(jnp.bfloat16),
                   preferred_element_type=jnp.float32)           # (Bt*h, N, d)
    attn = (o.reshape(Bt, n_heads, N, head_size)
             .transpose(0, 2, 1, 3)
             .reshape(rows, H))                                  # 'b h n d -> (b n)(h d)'
    attn = jnp.dot(attn.astype(jnp.bfloat16), wout_ref[0],
                   preferred_element_type=jnp.float32)
    x2 = attn + x2                                               # residual add

    # ------------------- feed-forward sub-layer (pre-norm) -------------------
    h_ln = _layer_norm(x2, ln2g_ref[0, 0], ln2b_ref[0, 0])
    h1 = jnp.dot(h_ln.astype(jnp.bfloat16), w1_ref[0],
                 preferred_element_type=jnp.float32) + b1_ref[0, 0]
    h1 = _gelu_exact(h1)
    h2 = jnp.dot(h1.astype(jnp.bfloat16), w2_ref[0],
                 preferred_element_type=jnp.float32) + b2_ref[0, 0]

    out_ref[...] = (h2 + x2).reshape(Bt, N, H).astype(out_ref.dtype)


def transformer_block(x, mask, params, *, n_heads, head_size, batch_tile=None):
    B, N, H = x.shape
    L = params["wqkv"].shape[0]
    M = params["w1"].shape[2]
    if batch_tile is None:
        batch_tile = B          # amortize each weight DMA over the full batch
    assert B % batch_tile == 0, "batch_tile must divide batch"
    nb = B // batch_tile        # note: on v7x, use batch_tile=B//2 (if B even)
    Bt = batch_tile             # to keep 2 parallel grid steps for both TCs

    # masked_fill_(-1e9) as an additive bias, computed once outside the grid
    attn_bias = mask.astype(jnp.float32) * jnp.float32(-1e9)     # (N, N)

    # Explicit VMEM budget: double-buffered bf16 weights + ln/bias vectors,
    # resident residual/out block, x block, attn bias, and the f32
    # score/probability/FFN intermediates, with ~1.5x headroom.
    rows = Bt * N
    w_bytes = 2 * (H * 3 * H + H * H + H * M + M * H)            # bf16, per layer
    vec_bytes = 4 * (5 * H + M)                                  # ln g/b, b1, b2
    io_bytes = 4 * (3 * rows * H + N * N)                        # x, out, bias
    inter_bytes = 4 * (rows * (9 * H + 2 * M) + 2 * Bt * n_heads * N * N)
    vmem_limit = int(1.5 * (2 * (w_bytes + vec_bytes) + io_bytes + inter_bytes))
    vmem_limit = max(16 << 20, min(vmem_limit + (2 << 20), 100 << 20))

    kernel = partial(transformer_block_kernel,
                     n_heads=n_heads, head_size=head_size)

    vec_H = pl.BlockSpec((1, 1, H), lambda b, l: (l, 0, 0))
    vec_M = pl.BlockSpec((1, 1, M), lambda b, l: (l, 0, 0))

    return pl.pallas_call(
        kernel,
        out_shape=jax.ShapeDtypeStruct((B, N, H), x.dtype),
        grid=(nb, L),
        in_specs=[
            pl.BlockSpec((N, N), lambda b, l: (0, 0)),            # attn bias
            pl.BlockSpec((Bt, N, H), lambda b, l: (b, 0, 0)),     # x (batch block)
            vec_H,                                                # ln1 gamma
            vec_H,                                                # ln1 beta
            pl.BlockSpec((1, H, 3 * H), lambda b, l: (l, 0, 0)),  # W_qkv (bf16, Q pre-scaled)
            pl.BlockSpec((1, H, H), lambda b, l: (l, 0, 0)),      # W_out (bf16)
            vec_H,                                                # ln2 gamma
            vec_H,                                                # ln2 beta
            pl.BlockSpec((1, H, M), lambda b, l: (l, 0, 0)),      # W1 (bf16)
            vec_M,                                                # b1
            pl.BlockSpec((1, M, H), lambda b, l: (l, 0, 0)),      # W2 (bf16)
            vec_H,                                                # b2
        ],
        out_specs=pl.BlockSpec((Bt, N, H), lambda b, l: (b, 0, 0)),
        compiler_params=pltpu.CompilerParams(
            dimension_semantics=("parallel", "arbitrary"),
            vmem_limit_bytes=vmem_limit),
    )(attn_bias, x,
      params["ln1_g"], params["ln1_b"], params["wqkv"], params["wout"],
      params["ln2_g"], params["ln2_b"], params["w1"], params["b1"],
      params["w2"], params["b2"])


def init_block_params(key, n_layers, n_heads, hidden_size, mlp_size):
    s = 0.02
    head_size = hidden_size // n_heads
    q_scale = 1.0 / math.sqrt(head_size)
    keys = jax.random.split(key, n_layers)

    def one(k):
        k0, k1, k2, k3, k4, k5 = jax.random.split(k, 6)
        wqkv = s * jax.random.normal(k0, (hidden_size, 3 * hidden_size), jnp.float32)
        # fold attention's 1/sqrt(head_size) into the Q columns (one-time init
        # transform -> no per-layer (rows, H) scale multiply in the kernel)
        wqkv = wqkv.at[:, :hidden_size].multiply(q_scale)
        return {
            "ln1_g": jnp.ones((1, hidden_size), jnp.float32),
            "ln1_b": jnp.zeros((1, hidden_size), jnp.float32),
            # weights stored pre-transposed (y = x @ W) and in bf16 for the MXU
            "wqkv": wqkv.astype(jnp.bfloat16),
            "wout": (s * jax.random.normal(k1, (hidden_size, hidden_size),
                                           jnp.float32)).astype(jnp.bfloat16),
            "ln2_g": jnp.ones((1, hidden_size), jnp.float32),
            "ln2_b": jnp.zeros((1, hidden_size), jnp.float32),
            "w1": (s * jax.random.normal(k2, (hidden_size, mlp_size),
                                         jnp.float32)).astype(jnp.bfloat16),
            "b1": s * jax.random.normal(k3, (1, mlp_size), jnp.float32),
            "w2": (s * jax.random.normal(k4, (mlp_size, hidden_size),
                                         jnp.float32)).astype(jnp.bfloat16),
            "b2": s * jax.random.normal(k5, (1, hidden_size), jnp.float32),
        }

    per_layer = [one(k) for k in keys]
    # stack along a leading layer axis so one pallas_call handles the stack
    return {name: jnp.stack([p[name] for p in per_layer], axis=0)
            for name in per_layer[0]}


if __name__ == "__main__":
    # small config consistent with the module
    n_layers, n_heads, hidden_size, mlp_size = 2, 4, 32, 64
    head_size = hidden_size // n_heads
    B, N = 2, 8

    key = jax.random.PRNGKey(0)
    kx, kp = jax.random.split(key)
    x = jax.random.normal(kx, (B, N, hidden_size), jnp.float32)

    # causal mask: 1.0 where attention is disallowed (masked_fill value -1e9)
    mask = jnp.triu(jnp.ones((N, N), jnp.float32), k=1)

    params = init_block_params(kp, n_layers, n_heads, hidden_size, mlp_size)

    out = transformer_block(x, mask, params, n_heads=n_heads, head_size=head_size)
    out = jax.block_until_ready(out)
    assert out.shape == (B, N, hidden_size)
    print("KERNEL_OK")
</pallas_src>

<mosaic_0001>
module attributes {stable_mosaic.version = 11 : i64} {
  func.func @transformer_block_kernel(%arg0: i32, %arg1: i32, %arg2: memref<8x8xf32, #tpu.memory_space<vmem>>, %arg3: memref<2x8x32xf32, #tpu.memory_space<vmem>>, %arg4: memref<1x1x32xf32, #tpu.memory_space<vmem>>, %arg5: memref<1x1x32xf32, #tpu.memory_space<vmem>>, %arg6: memref<1x32x96xbf16, #tpu.memory_space<vmem>>, %arg7: memref<1x32x32xbf16, #tpu.memory_space<vmem>>, %arg8: memref<1x1x32xf32, #tpu.memory_space<vmem>>, %arg9: memref<1x1x32xf32, #tpu.memory_space<vmem>>, %arg10: memref<1x32x64xbf16, #tpu.memory_space<vmem>>, %arg11: memref<1x1x64xf32, #tpu.memory_space<vmem>>, %arg12: memref<1x64x32xbf16, #tpu.memory_space<vmem>>, %arg13: memref<1x1x32xf32, #tpu.memory_space<vmem>>, %arg14: memref<2x8x32xf32, #tpu.memory_space<vmem>>) attributes {dimension_semantics = [#tpu.dimension_semantics<parallel>, #tpu.dimension_semantics<arbitrary>], iteration_bounds = array<i64: 1, 2>, scalar_prefetch = 0 : i64, scratch_operands = 0 : i64, tpu.core_type = #tpu.core_type<tc>, window_params = [{pipeline_mode = #tpu.pipeline_mode<synchronous>, transform_indices = @transform_0, window_bounds = array<i64: 8, 8>}, {transform_indices = @transform_1, window_bounds = array<i64: 2, 8, 32>}, {transform_indices = @transform_2, window_bounds = array<i64: 1, 1, 32>}, {transform_indices = @transform_3, window_bounds = array<i64: 1, 1, 32>}, {transform_indices = @transform_4, window_bounds = array<i64: 1, 32, 96>}, {transform_indices = @transform_5, window_bounds = array<i64: 1, 32, 32>}, {transform_indices = @transform_6, window_bounds = array<i64: 1, 1, 32>}, {transform_indices = @transform_7, window_bounds = array<i64: 1, 1, 32>}, {transform_indices = @transform_8, window_bounds = array<i64: 1, 32, 64>}, {transform_indices = @transform_9, window_bounds = array<i64: 1, 1, 64>}, {transform_indices = @transform_10, window_bounds = array<i64: 1, 64, 32>}, {transform_indices = @transform_11, window_bounds = array<i64: 1, 1, 32>}, {transform_indices = @transform_12, window_bounds = array<i64: 2, 8, 32>}]} {
    %c0_i32 = arith.constant 0 : i32
    %0 = arith.cmpi eq, %arg1, %c0_i32 : i32
    %1 = arith.extui %0 : i1 to i32
    %c0_i32_0 = arith.constant 0 : i32
    %2 = arith.cmpi ne, %1, %c0_i32_0 : i32
    scf.if %2 {
      %c0_58 = arith.constant 0 : index
      %c0_59 = arith.constant 0 : index
      %c0_60 = arith.constant 0 : index
      %134 = vector.load %arg3[%c0_58, %c0_59, %c0_60] : memref<2x8x32xf32, #tpu.memory_space<vmem>>, vector<2x8x32xf32>
      %c0_61 = arith.constant 0 : index
      %c0_62 = arith.constant 0 : index
      %c0_63 = arith.constant 0 : index
      %135 = vector.load %arg14[%c0_61, %c0_62, %c0_63] : memref<2x8x32xf32, #tpu.memory_space<vmem>>, vector<2x8x32xf32>
      tpu.vector_store %arg14[%c0_61, %c0_62, %c0_63], %134 {strides = array<i32>} : memref<2x8x32xf32, #tpu.memory_space<vmem>>, vector<2x8x32xf32>,
    } else {
    }
    %c0 = arith.constant 0 : index
    %c0_1 = arith.constant 0 : index
    %c0_2 = arith.constant 0 : index
    %3 = vector.load %arg14[%c0, %c0_1, %c0_2] : memref<2x8x32xf32, #tpu.memory_space<vmem>>, vector<2x8x32xf32>
    %4 = vector.shape_cast %3 : vector<2x8x32xf32> to vector<16x32xf32>
    %c0_3 = arith.constant 0 : index
    %c0_4 = arith.constant 0 : index
    %c0_5 = arith.constant 0 : index
    %5 = vector.load %arg4[%c0_3, %c0_4, %c0_5] : memref<1x1x32xf32, #tpu.memory_space<vmem>>, vector<1x1x32xf32>
    %6 = vector.shape_cast %5 : vector<1x1x32xf32> to vector<32xf32>
    %c0_6 = arith.constant 0 : index
    %c0_7 = arith.constant 0 : index
    %c0_8 = arith.constant 0 : index
    %7 = vector.load %arg5[%c0_6, %c0_7, %c0_8] : memref<1x1x32xf32, #tpu.memory_space<vmem>>, vector<1x1x32xf32>
    %8 = vector.shape_cast %7 : vector<1x1x32xf32> to vector<32xf32>
    %cst = arith.constant dense<0.000000e+00> : vector<16xf32>
    %9 = vector.multi_reduction <add>, %4, %cst [1] : vector<16x32xf32> to vector<16xf32>
    %10 = vector.shape_cast %9 : vector<16xf32> to vector<16x1xf32>
    %cst_9 = arith.constant 3.200000e+01 : f32
    %11 = vector.broadcast %cst_9 : f32 to vector<16x1xf32>
    %12 = arith.divf %10, %11 : vector<16x1xf32>
    %13 = vector.broadcast %12 : vector<16x1xf32> to vector<16x32xf32>
    %14 = arith.subf %4, %13 : vector<16x32xf32>
    %15 = arith.mulf %14, %14 : vector<16x32xf32>
    %cst_10 = arith.constant dense<0.000000e+00> : vector<16xf32>
    %16 = vector.multi_reduction <add>, %15, %cst_10 [1] : vector<16x32xf32> to vector<16xf32>
    %17 = vector.shape_cast %16 : vector<16xf32> to vector<16x1xf32>
    %cst_11 = arith.constant 3.200000e+01 : f32
    %18 = vector.broadcast %cst_11 : f32 to vector<16x1xf32>
    %19 = arith.divf %17, %18 : vector<16x1xf32>
    %20 = vector.broadcast %12 : vector<16x1xf32> to vector<16x32xf32>
    %21 = arith.subf %4, %20 : vector<16x32xf32>
    %cst_12 = arith.constant 9.99999974E-6 : f32
    %22 = vector.broadcast %cst_12 : f32 to vector<16x1xf32>
    %23 = arith.addf %19, %22 : vector<16x1xf32>
    %24 = math.rsqrt %23 : vector<16x1xf32>
    %25 = vector.broadcast %24 : vector<16x1xf32> to vector<16x32xf32>
    %26 = arith.mulf %21, %25 : vector<16x32xf32>
    %27 = vector.shape_cast %6 : vector<32xf32> to vector<1x32xf32>
    %28 = vector.broadcast %27 : vector<1x32xf32> to vector<16x32xf32>
    %29 = arith.mulf %26, %28 : vector<16x32xf32>
    %30 = vector.shape_cast %8 : vector<32xf32> to vector<1x32xf32>
    %31 = vector.broadcast %30 : vector<1x32xf32> to vector<16x32xf32>
    %32 = arith.addf %29, %31 : vector<16x32xf32>
    %33 = arith.truncf %32 : vector<16x32xf32> to vector<16x32xbf16>
    %c0_13 = arith.constant 0 : index
    %c0_14 = arith.constant 0 : index
    %c0_15 = arith.constant 0 : index
    %34 = vector.load %arg6[%c0_13, %c0_14, %c0_15] : memref<1x32x96xbf16, #tpu.memory_space<vmem>>, vector<1x32x96xbf16>
    %35 = vector.shape_cast %34 : vector<1x32x96xbf16> to vector<32x96xbf16>
    %cst_16 = arith.constant dense<0.000000e+00> : vector<16x96xf32>
    %36 = tpu.matmul %33, %35, %cst_16 {dimension_numbers = #tpu.dot_dimension_numbers<[1], [0], [0], [1], [0, 0, 1, 1], [], []>} : vector<16x32xbf16>, vector<32x96xbf16>, vector<16x96xf32> -> vector<16x96xf32>
    %37 = vector.extract_strided_slice %36 {offsets = [0, 0], sizes = [16, 32], strides = [1, 1]} : vector<16x96xf32> to vector<16x32xf32>
    %38 = vector.shape_cast %37 : vector<16x32xf32> to vector<2x8x4x8xf32>
    %39 = tpu.transpose %38, [0, 2, 1, 3] : vector<2x8x4x8xf32> -> vector<2x4x8x8xf32>
    %40 = vector.shape_cast %39 : vector<2x4x8x8xf32> to vector<8x8x8xf32>
    %41 = vector.extract_strided_slice %36 {offsets = [0, 32], sizes = [16, 32], strides = [1, 1]} : vector<16x96xf32> to vector<16x32xf32>
    %42 = vector.shape_cast %41 : vector<16x32xf32> to vector<2x8x4x8xf32>
    %43 = tpu.transpose %42, [0, 2, 1, 3] : vector<2x8x4x8xf32> -> vector<2x4x8x8xf32>
    %44 = vector.shape_cast %43 : vector<2x4x8x8xf32> to vector<8x8x8xf32>
    %45 = vector.extract_strided_slice %36 {offsets = [0, 64], sizes = [16, 32], strides = [1, 1]} : vector<16x96xf32> to vector<16x32xf32>
    %46 = vector.shape_cast %45 : vector<16x32xf32> to vector<2x8x4x8xf32>
    %47 = tpu.transpose %46, [0, 2, 1, 3] : vector<2x8x4x8xf32> -> vector<2x4x8x8xf32>
    %48 = vector.shape_cast %47 : vector<2x4x8x8xf32> to vector<8x8x8xf32>
    %49 = arith.truncf %40 : vector<8x8x8xf32> to vector<8x8x8xbf16>
    %50 = arith.truncf %44 : vector<8x8x8xf32> to vector<8x8x8xbf16>
    "tpu.trace_start"() <{level = 10 : i32, message = "gnd,gmd->gnm"}> : () -> ()
    %cst_17 = arith.constant dense<0.000000e+00> : vector<8x8x8xf32>
    %51 = tpu.matmul %49, %50, %cst_17 {dimension_numbers = #tpu.dot_dimension_numbers<[2], [2], [1], [1], [0, 0, 0, 1, 1, 1], [0], [0]>} : vector<8x8x8xbf16>, vector<8x8x8xbf16>, vector<8x8x8xf32> -> vector<8x8x8xf32>
    "tpu.trace_stop"() : () -> ()
    %c0_18 = arith.constant 0 : index
    %c0_19 = arith.constant 0 : index
    %52 = vector.load %arg2[%c0_18, %c0_19] : memref<8x8xf32, #tpu.memory_space<vmem>>, vector<8x8xf32>
    %53 = vector.shape_cast %52 : vector<8x8xf32> to vector<1x8x8xf32>
    %54 = vector.broadcast %53 : vector<1x8x8xf32> to vector<8x8x8xf32>
    %55 = arith.addf %51, %54 : vector<8x8x8xf32>
    %cst_20 = arith.constant dense<0xFF800000> : vector<8x8xf32>
    %56 = vector.multi_reduction <maximumf>, %55, %cst_20 [2] : vector<8x8x8xf32> to vector<8x8xf32>
    %57 = vector.shape_cast %56 : vector<8x8xf32> to vector<8x8x1xf32>
    %58 = vector.broadcast %57 : vector<8x8x1xf32> to vector<8x8x8xf32>
    %59 = arith.subf %55, %58 : vector<8x8x8xf32>
    %60 = math.exp %59 : vector<8x8x8xf32>
    %cst_21 = arith.constant dense<0.000000e+00> : vector<8x8xf32>
    %61 = vector.multi_reduction <add>, %60, %cst_21 [2] : vector<8x8x8xf32> to vector<8x8xf32>
    %62 = vector.shape_cast %61 : vector<8x8xf32> to vector<8x8x1xf32>
    %63 = tpu.reciprocal %62 {approx = true} : vector<8x8x1xf32> -> vector<8x8x1xf32>
    %64 = vector.broadcast %63 : vector<8x8x1xf32> to vector<8x8x8xf32>
    %65 = arith.mulf %60, %64 : vector<8x8x8xf32>
    %66 = arith.truncf %65 : vector<8x8x8xf32> to vector<8x8x8xbf16>
    %67 = arith.truncf %48 : vector<8x8x8xf32> to vector<8x8x8xbf16>
    "tpu.trace_start"() <{level = 10 : i32, message = "gnm,gmd->gnd"}> : () -> ()
    %cst_22 = arith.constant dense<0.000000e+00> : vector<8x8x8xf32>
    %68 = tpu.matmul %66, %67, %cst_22 {dimension_numbers = #tpu.dot_dimension_numbers<[2], [1], [1], [2], [0, 0, 0, 1, 1, 2], [0], [0]>} : vector<8x8x8xbf16>, vector<8x8x8xbf16>, vector<8x8x8xf32> -> vector<8x8x8xf32>
    "tpu.trace_stop"() : () -> ()
    %69 = vector.shape_cast %68 : vector<8x8x8xf32> to vector<2x4x8x8xf32>
    %70 = tpu.transpose %69, [0, 2, 1, 3] : vector<2x4x8x8xf32> -> vector<2x8x4x8xf32>
    %71 = vector.shape_cast %70 : vector<2x8x4x8xf32> to vector<16x32xf32>
    %72 = arith.truncf %71 : vector<16x32xf32> to vector<16x32xbf16>
    %c0_23 = arith.constant 0 : index
    %c0_24 = arith.constant 0 : index
    %c0_25 = arith.constant 0 : index
    %73 = vector.load %arg7[%c0_23, %c0_24, %c0_25] : memref<1x32x32xbf16, #tpu.memory_space<vmem>>, vector<1x32x32xbf16>
    %74 = vector.shape_cast %73 : vector<1x32x32xbf16> to vector<32x32xbf16>
    %cst_26 = arith.constant dense<0.000000e+00> : vector<16x32xf32>
    %75 = tpu.matmul %72, %74, %cst_26 {dimension_numbers = #tpu.dot_dimension_numbers<[1], [0], [0], [1], [0, 0, 1, 1], [], []>} : vector<16x32xbf16>, vector<32x32xbf16>, vector<16x32xf32> -> vector<16x32xf32>
    %76 = arith.addf %75, %4 : vector<16x32xf32>
    %c0_27 = arith.constant 0 : index
    %c0_28 = arith.constant 0 : index
    %c0_29 = arith.constant 0 : index
    %77 = vector.load %arg8[%c0_27, %c0_28, %c0_29] : memref<1x1x32xf32, #tpu.memory_space<vmem>>, vector<1x1x32xf32>
    %78 = vector.shape_cast %77 : vector<1x1x32xf32> to vector<32xf32>
    %c0_30 = arith.constant 0 : index
    %c0_31 = arith.constant 0 : index
    %c0_32 = arith.constant 0 : index
    %79 = vector.load %arg9[%c0_30, %c0_31, %c0_32] : memref<1x1x32xf32, #tpu.memory_space<vmem>>, vector<1x1x32xf32>
    %80 = vector.shape_cast %79 : vector<1x1x32xf32> to vector<32xf32>
    %cst_33 = arith.constant dense<0.000000e+00> : vector<16xf32>
    %81 = vector.multi_reduction <add>, %76, %cst_33 [1] : vector<16x32xf32> to vector<16xf32>
    %82 = vector.shape_cast %81 : vector<16xf32> to vector<16x1xf32>
    %cst_34 = arith.constant 3.200000e+01 : f32
    %83 = vector.broadcast %cst_34 : f32 to vector<16x1xf32>
    %84 = arith.divf %82, %83 : vector<16x1xf32>
    %85 = vector.broadcast %84 : vector<16x1xf32> to vector<16x32xf32>
    %86 = arith.subf %76, %85 : vector<16x32xf32>
    %87 = arith.mulf %86, %86 : vector<16x32xf32>
    %cst_35 = arith.constant dense<0.000000e+00> : vector<16xf32>
    %88 = vector.multi_reduction <add>, %87, %cst_35 [1] : vector<16x32xf32> to vector<16xf32>
    %89 = vector.shape_cast %88 : vector<16xf32> to vector<16x1xf32>
    %cst_36 = arith.constant 3.200000e+01 : f32
    %90 = vector.broadcast %cst_36 : f32 to vector<16x1xf32>
    %91 = arith.divf %89, %90 : vector<16x1xf32>
    %92 = vector.broadcast %84 : vector<16x1xf32> to vector<16x32xf32>
    %93 = arith.subf %76, %92 : vector<16x32xf32>
    %cst_37 = arith.constant 9.99999974E-6 : f32
    %94 = vector.broadcast %cst_37 : f32 to vector<16x1xf32>
    %95 = arith.addf %91, %94 : vector<16x1xf32>
    %96 = math.rsqrt %95 : vector<16x1xf32>
    %97 = vector.broadcast %96 : vector<16x1xf32> to vector<16x32xf32>
    %98 = arith.mulf %93, %97 : vector<16x32xf32>
    %99 = vector.shape_cast %78 : vector<32xf32> to vector<1x32xf32>
    %100 = vector.broadcast %99 : vector<1x32xf32> to vector<16x32xf32>
    %101 = arith.mulf %98, %100 : vector<16x32xf32>
    %102 = vector.shape_cast %80 : vector<32xf32> to vector<1x32xf32>
    %103 = vector.broadcast %102 : vector<1x32xf32> to vector<16x32xf32>
    %104 = arith.addf %101, %103 : vector<16x32xf32>
    %105 = arith.truncf %104 : vector<16x32xf32> to vector<16x32xbf16>
    %c0_38 = arith.constant 0 : index
    %c0_39 = arith.constant 0 : index
    %c0_40 = arith.constant 0 : index
    %106 = vector.load %arg10[%c0_38, %c0_39, %c0_40] : memref<1x32x64xbf16, #tpu.memory_space<vmem>>, vector<1x32x64xbf16>
    %107 = vector.shape_cast %106 : vector<1x32x64xbf16> to vector<32x64xbf16>
    %cst_41 = arith.constant dense<0.000000e+00> : vector<16x64xf32>
    %108 = tpu.matmul %105, %107, %cst_41 {dimension_numbers = #tpu.dot_dimension_numbers<[1], [0], [0], [1], [0, 0, 1, 1], [], []>} : vector<16x32xbf16>, vector<32x64xbf16>, vector<16x64xf32> -> vector<16x64xf32>
    %c0_42 = arith.constant 0 : index
    %c0_43 = arith.constant 0 : index
    %c0_44 = arith.constant 0 : index
    %109 = vector.load %arg11[%c0_42, %c0_43, %c0_44] : memref<1x1x64xf32, #tpu.memory_space<vmem>>, vector<1x1x64xf32>
    %110 = vector.shape_cast %109 : vector<1x1x64xf32> to vector<64xf32>
    %111 = vector.shape_cast %110 : vector<64xf32> to vector<1x64xf32>
    %112 = vector.broadcast %111 : vector<1x64xf32> to vector<16x64xf32>
    %113 = arith.addf %108, %112 : vector<16x64xf32>
    %cst_45 = arith.constant 5.000000e-01 : f32
    %114 = vector.broadcast %cst_45 : f32 to vector<16x64xf32>
    %115 = arith.mulf %114, %113 : vector<16x64xf32>
    %cst_46 = arith.constant 0.707106769 : f32
    %116 = vector.broadcast %cst_46 : f32 to vector<16x64xf32>
    %117 = arith.mulf %113, %116 : vector<16x64xf32>
    %118 = math.erf %117 : vector<16x64xf32>
    %cst_47 = arith.constant 1.000000e+00 : f32
    %119 = vector.broadcast %cst_47 : f32 to vector<16x64xf32>
    %120 = arith.addf %119, %118 : vector<16x64xf32>
    %121 = arith.mulf %115, %120 : vector<16x64xf32>
    %122 = arith.truncf %121 : vector<16x64xf32> to vector<16x64xbf16>
    %c0_48 = arith.constant 0 : index
    %c0_49 = arith.constant 0 : index
    %c0_50 = arith.constant 0 : index
    %123 = vector.load %arg12[%c0_48, %c0_49, %c0_50] : memref<1x64x32xbf16, #tpu.memory_space<vmem>>, vector<1x64x32xbf16>
    %124 = vector.shape_cast %123 : vector<1x64x32xbf16> to vector<64x32xbf16>
    %cst_51 = arith.constant dense<0.000000e+00> : vector<16x32xf32>
    %125 = tpu.matmul %122, %124, %cst_51 {dimension_numbers = #tpu.dot_dimension_numbers<[1], [0], [0], [1], [0, 0, 1, 1], [], []>} : vector<16x64xbf16>, vector<64x32xbf16>, vector<16x32xf32> -> vector<16x32xf32>
    %c0_52 = arith.constant 0 : index
    %c0_53 = arith.constant 0 : index
    %c0_54 = arith.constant 0 : index
    %126 = vector.load %arg13[%c0_52, %c0_53, %c0_54] : memref<1x1x32xf32, #tpu.memory_space<vmem>>, vector<1x1x32xf32>
    %127 = vector.shape_cast %126 : vector<1x1x32xf32> to vector<32xf32>
    %128 = vector.shape_cast %127 : vector<32xf32> to vector<1x32xf32>
    %129 = vector.broadcast %128 : vector<1x32xf32> to vector<16x32xf32>
    %130 = arith.addf %125, %129 : vector<16x32xf32>
    %131 = arith.addf %130, %76 : vector<16x32xf32>
    %132 = vector.shape_cast %131 : vector<16x32xf32> to vector<2x8x32xf32>
    %c0_55 = arith.constant 0 : index
    %c0_56 = arith.constant 0 : index
    %c0_57 = arith.constant 0 : index
    %133 = vector.load %arg14[%c0_55, %c0_56, %c0_57] : memref<2x8x32xf32, #tpu.memory_space<vmem>>, vector<2x8x32xf32>
    tpu.vector_store %arg14[%c0_55, %c0_56, %c0_57], %132 {strides = array<i32>} : memref<2x8x32xf32, #tpu.memory_space<vmem>>, vector<2x8x32xf32>,
    return
  }
  func.func @transform_0(%arg0: i32, %arg1: i32) -> (i32, i32) {
    %c0_i32 = arith.constant 0 : i32
    %c0_i32_0 = arith.constant 0 : i32
    %c0_i32_1 = arith.constant 0 : i32
    return %c0_i32, %c0_i32_0 : i32, i32
  }
  func.func @transform_1(%arg0: i32, %arg1: i32) -> (i32, i32, i32) {
    %c0_i32 = arith.constant 0 : i32
    %c0_i32_0 = arith.constant 0 : i32
    %c0_i32_1 = arith.constant 0 : i32
    return %arg0, %c0_i32, %c0_i32_0 : i32, i32, i32
  }
  func.func @transform_2(%arg0: i32, %arg1: i32) -> (i32, i32, i32) {
    %c0_i32 = arith.constant 0 : i32
    %c0_i32_0 = arith.constant 0 : i32
    %c0_i32_1 = arith.constant 0 : i32
    return %arg1, %c0_i32, %c0_i32_0 : i32, i32, i32
  }
  func.func @transform_3(%arg0: i32, %arg1: i32) -> (i32, i32, i32) {
    %c0_i32 = arith.constant 0 : i32
    %c0_i32_0 = arith.constant 0 : i32
    %c0_i32_1 = arith.constant 0 : i32
    return %arg1, %c0_i32, %c0_i32_0 : i32, i32, i32
  }
  func.func @transform_4(%arg0: i32, %arg1: i32) -> (i32, i32, i32) {
    %c0_i32 = arith.constant 0 : i32
    %c0_i32_0 = arith.constant 0 : i32
    %c0_i32_1 = arith.constant 0 : i32
    return %arg1, %c0_i32, %c0_i32_0 : i32, i32, i32
  }
  func.func @transform_5(%arg0: i32, %arg1: i32) -> (i32, i32, i32) {
    %c0_i32 = arith.constant 0 : i32
    %c0_i32_0 = arith.constant 0 : i32
    %c0_i32_1 = arith.constant 0 : i32
    return %arg1, %c0_i32, %c0_i32_0 : i32, i32, i32
  }
  func.func @transform_6(%arg0: i32, %arg1: i32) -> (i32, i32, i32) {
    %c0_i32 = arith.constant 0 : i32
    %c0_i32_0 = arith.constant 0 : i32
    %c0_i32_1 = arith.constant 0 : i32
    return %arg1, %c0_i32, %c0_i32_0 : i32, i32, i32
  }
  func.func @transform_7(%arg0: i32, %arg1: i32) -> (i32, i32, i32) {
    %c0_i32 = arith.constant 0 : i32
    %c0_i32_0 = arith.constant 0 : i32
    %c0_i32_1 = arith.constant 0 : i32
    return %arg1, %c0_i32, %c0_i32_0 : i32, i32, i32
  }
  func.func @transform_8(%arg0: i32, %arg1: i32) -> (i32, i32, i32) {
    %c0_i32 = arith.constant 0 : i32
    %c0_i32_0 = arith.constant 0 : i32
    %c0_i32_1 = arith.constant 0 : i32
    return %arg1, %c0_i32, %c0_i32_0 : i32, i32, i32
  }
  func.func @transform_9(%arg0: i32, %arg1: i32) -> (i32, i32, i32) {
    %c0_i32 = arith.constant 0 : i32
    %c0_i32_0 = arith.constant 0 : i32
    %c0_i32_1 = arith.constant 0 : i32
    return %arg1, %c0_i32, %c0_i32_0 : i32, i32, i32
  }
  func.func @transform_10(%arg0: i32, %arg1: i32) -> (i32, i32, i32) {
    %c0_i32 = arith.constant 0 : i32
    %c0_i32_0 = arith.constant 0 : i32
    %c0_i32_1 = arith.constant 0 : i32
    return %arg1, %c0_i32, %c0_i32_0 : i32, i32, i32
  }
  func.func @transform_11(%arg0: i32, %arg1: i32) -> (i32, i32, i32) {
    %c0_i32 = arith.constant 0 : i32
    %c0_i32_0 = arith.constant 0 : i32
    %c0_i32_1 = arith.constant 0 : i32
    return %arg1, %c0_i32, %c0_i32_0 : i32, i32, i32
  }
  func.func @transform_12(%arg0: i32, %arg1: i32) -> (i32, i32, i32) {
    %c0_i32 = arith.constant 0 : i32
    %c0_i32_0 = arith.constant 0 : i32
    %c0_i32_1 = arith.constant 0 : i32
    return %arg0, %c0_i32, %c0_i32_0 : i32, i32, i32
  }
}

</mosaic_0001>

<bundles_post_ra>
// kernel: tpu_custom_call.1
= control target key start
LH: loop header
LB: loop body
LE: loop exit
PB: predicated region body
PF: predicated region fallthrough
CT: control target
= control target key end

     0   :  { %s4846_s0 = inlined_call_operand.hbm [shape: f32[8,8], index: 0, kind: input, shape index: {}]   ;;  %s4847_s1 = inlined_call_operand.hbm [shape: f32[2,8,32], index: 1, kind: input, shape index: {}]   ;;  %s4848_s2 = inlined_call_operand.vmem [shape: f32[2,1,32], index: 2, kind: input, shape index: {}]   ;;  %s4849_s3 = inlined_call_operand.vmem [shape: f32[2,1,32], index: 3, kind: input, shape index: {}]   ;;  %s4850_s4 = inlined_call_operand.vmem [shape: bf16[2,32,96], index: 4, kind: input, shape index: {}]   ;;  %s4851_s5 = inlined_call_operand.vmem [shape: bf16[2,32,32], index: 5, kind: input, shape index: {}]   ;;  %s4852_s6 = inlined_call_operand.hbm [shape: f32[2,1,32], index: 6, kind: input, shape index: {}]   ;;  %s4853_s7 = inlined_call_operand.hbm [shape: f32[2,1,32], index: 7, kind: input, shape index: {}]   ;;  %s4854_s8 = inlined_call_operand.vmem [shape: bf16[2,32,64], index: 8, kind: input, shape index: {}]   ;;  %s4855_s9 = inlined_call_operand.hbm [shape: f32[2,1,64], index: 9, kind: input, shape index: {}]   ;;  %s4856_s10 = inlined_call_operand.vmem [shape: bf16[2,64,32], index: 10, kind: input, shape index: {}]   ;;  %s4857_s11 = inlined_call_operand.vmem [shape: f32[2,1,32], index: 11, kind: input, shape index: {}]   ;;  %s4858_s12 = inlined_call_operand.hbm [shape: f32[2,8,32], index: 12, kind: output, shape index: {}]  }
   0x1   :  { %4873 = sst [smem:[#allocation20_spill]] %s4846_s0 }
   0x2   :  { %4874 = sst [smem:[#allocation21_spill]] %s4847_s1 }
   0x3   :  { %4875 = sst [smem:[#allocation22_spill]] %s4852_s6 }
   0x4   :  { %4876 = sst [smem:[#allocation23_spill]] %s4854_s8 }
   0x5   :  { %4877 = sst [smem:[#allocation24_spill]] %s4856_s10 }
   0x6   :  { %4878 = sst [smem:[#allocation25_spill]] %s4857_s11 }
   0x7   :  { %4879 = sst [smem:[#allocation26_spill]] %s4858_s12 }
   0x8   :  { %17 = vsyncpa [#allocation3], 0 }
   0x9   :  { %18 = vsyncpa [#allocation6], 0 }
   0xa   :  { %19 = vsyncpa [#allocation4], 0  ;;  %s4047_s21 = smov 0   ;;  %s4049_s22 = smov 0  }
   0xb   :  { %s4051_s23 = smov 0   ;;  %s4053_s24 = smov 0  }
   0xc   :  { %s4055_s25 = smov 0   ;;  %s4057_s26 = smov 0  }
   0xd LB: > { %4880 = sst [smem:[#allocation15_spill]] %s3947_s23  ;;  %s4076_s27 = sadd.s32 4294967295, %s3959_s26   ;;  %s3959_s26 = sphi %s4057_s26, %s25_s26   ;;  %s3955_s25 = sphi %s4055_s25, %s4922_s25   ;;  %s3951_s24 = sphi %s4053_s24, %s4921_s24   ;;  %s3947_s23 = sphi %s4051_s23, %s4920_s23   ;;  %s3943_s22 = sphi %s4049_s22, %s4924_s22   ;;  %s3939_s21 = sphi %s4047_s21, %s4923_s21  }
   0xe   : > { %4881 = sst [smem:[#allocation16_spill]] %s3955_s25  ;;  %p208_p1 = scmp.ne.s32.totalorder %s3943_s22, %s3939_s21 }
   0xf   : > { %4882 = sst [smem:[#allocation17_spill]] %s3959_s26  ;;  %p4860_p2 = scmp.eq.s32.totalorder %s4076_s27, 0 }
  0x10   : > { %p3289_p3 = scmp.ge.s32.totalorder %s3959_s26, 1  ;;  %p375_p4 = scmp.lt.s32.totalorder %s3959_s26, 3 }
  0x11   : > { %p4086_p5 = por %p4860_p2, %p208_p1  ;;  %s3961_s30 = smov [#allocation2]  }
  0x12   : > { %p4090_p6 = pnand %p3289_p3, %p375_p4  ;;  %s388_s13 = sshll.u32 %s3961_s30, 4  ;;  %s389_s13 = int_to_ptr.vmem [resolvable:$true] %s388_s13 }
  0x13   : > { %s4883_s28 = scalar_select %p4086_p5, 1, 0 }
  0x14   : > { %s4884_s29 = scalar_select %p4090_p6, 1, 0 }
  0x15   : > { %p3564_p7 = pneg %p4090_p6  ;;  %s34_s16 = sadd.s32 1, %s3955_s25 }
  0x16   : > { %p4105_p10 = scmp.ge.s32.totalorder %s34_s16, 2  ;;  %s4887_s0 = sld [smem:[#allocation20_spill]] }
  0x17   : > { %p4099_p8 = pnand %p3564_p7, %p4860_p2 }
  0x18   : > { %s4886_s17 = scalar_select %p4105_p10, 1, 0 }
  0x19   : > { %s4885_s15 = scalar_select %p4099_p8, 1, 0 }
  0x1a   : > { %p4867_p12 = pneg %p4099_p8 }
  0x1c   : > { %s3725_s20 = scalar_lea.hbm %s4887_s0, 128 }
  0x1d   : > { %p3726_p11 = scmp.ne.s32.totalorder %s4887_s0, %s3725_s20  ;;  %p3732_p3 = scmp.lt.u32.totalorder %s3725_s20, %s4887_s0 }
  0x1f   : > { %p3728_p13 = pnand %p4867_p12, %p3726_p11 }
  0x21   : > { %p3729_p1 = pneg %p3728_p13 }
  0x23   : > { %p3734_p4 = pnand %p3732_p3, %p3729_p1 }
  0x25   : > { %3737 = shalt.err (!%p3734_p4)
}
  0x26   : > { %s3738_s11 = scalar_lea.vmem %s389_s13, 128  ;;  %p3746_p0 = scmp.lt.s32.totalorder %s389_s13, %s389_s13 }
  0x27   : > { %p3739_p7 = scmp.ne.s32.totalorder %s389_s13, %s3738_s11  ;;  %p3747_p5 = scmp.lt.s32.totalorder %s3738_s11, %s3738_s11 }
  0x29   : > { %p3741_p2 = pnand %p3739_p7, %p4867_p12  ;;  %p3748_p6 = por %p3747_p5, %p3746_p0 }
  0x2b   : > { %p3742_p9 = pneg %p3741_p2 }
  0x2d   : > { %p3749_p10 = pnand %p3748_p6, %p3742_p9 }
  0x2f   : > { %3752 = shalt.err (!%p3749_p10)
}
  0x30   : > { %3567 = dma.hbm_to_vmem [thread:$0]  (!%p4099_p8), %s4887_s0, 128, %s389_s13, [#allocation3]  }
  0x31   : > { %p4888_p0 = scmp.ne.s32.totalorder %s4886_s17, 0  ;;  %p4890_p2 = scmp.ne.s32.totalorder %s3947_s23, %s3943_s22 }
  0x32   : > { %p4891_p5 = scmp.eq.s32.totalorder %s3959_s26, 0  ;;  %p3583_p9 = scmp.lt.s32.totalorder %s3959_s26, 2 }
  0x33   : > { %s4926_s16 = smov (%p4888_p0, %s34_s16), 0  ;;  %s443_s12 = sand.u32 1, %s3959_s26  }
  0x34   : > { %4889 = sst [smem:[#allocation18_spill]] %s4926_s16  ;;  %p204_p6 = por %p4891_p5, %p4890_p2 }
  0x35   : > { %s192_s11 = ssub.s32 %s3955_s25, %s4926_s16  ;;  %s4145_s14 = sand.u32 1, %s3947_s23  }
  0x36   : > { %p193_p10 = scmp.eq.s32.totalorder %s192_s11, 0  ;;  %s4148_s20 = sshll.u32 %s3955_s25, 4 }
  0x37   : > { %s4892_s21 = sadd.s32 1, %s3947_s23  ;;  %s4894_s6 = sld [smem:[#allocation22_spill]] }
  0x38   : > { %s4153_s13 = scalar_select %p193_p10, %s3947_s23, %s4892_s21  }
  0x39   : > { %s446_s19 = scalar_lea.vmem [#allocation7], %s4145_s14  ;;  %p4162_p11 = pnand %p3583_p9, %p204_p6 }
  0x3a   : > { %4893 = sst [smem:[#allocation19_spill]] %s4153_s13  ;;  %s453_s11 = sshll.u32 %s446_s19, 4  ;;  %s4166_s11 = int_to_ptr.vmem [resolvable:$true] %s453_s11 }
  0x3b   : > { %s4895_s0 = scalar_select %p4162_p11, 1, 0 }
  0x3c   : > { %s4172_s25 = scalar_lea.hbm %s4853_s7, %s4148_s20  ;;  %s4174_s17 = scalar_lea.sflag [#allocation3], %s443_s12 }
  0x3d   : > { %s4159_s18 = scalar_lea.hbm %s4894_s6, %s4148_s20  ;;  %p4180_p1 = pneg %p4162_p11 }
  0x3e   : > { %s3753_s30 = scalar_lea.hbm %s4159_s18, 16  ;;  %s3758_s26 = scalar_lea.hbm %s4894_s6, 32 }
  0x3f   : > { %p3754_p13 = scmp.ne.s32.totalorder %s4159_s18, %s3753_s30  ;;  %p3759_p7 = scmp.lt.u32.totalorder %s4159_s18, %s4894_s6 }
  0x40   : > { %s4896_s13 = scalar_select %p4180_p1, 1, 0 }
  0x41   : > { %p3756_p3 = pnand %p4180_p1, %p3754_p13  ;;  %p3760_p0 = scmp.lt.u32.totalorder %s3758_s26, %s3753_s30 }
  0x42   : > { %p3762_p5 = scmp.lt.u32.totalorder %s3753_s30, %s4159_s18 }
  0x43   : > { %p3757_p4 = pneg %p3756_p3  ;;  %p3761_p2 = por %p3760_p0, %p3759_p7 }
  0x45   : > { %p3763_p6 = por %p3762_p5, %p3761_p2 }
  0x47   : > { %p3764_p9 = pnand %p3763_p6, %p3757_p4 }
  0x49   : > { %3767 = shalt.err (!%p3764_p9)
}
  0x4a   : > { %s3768_s12 = scalar_lea.vmem %s4166_s11, 16  ;;  %s3962_s23 = smov [#allocation7]  }
  0x4b   : > { %p3769_p10 = scmp.ne.s32.totalorder %s4166_s11, %s3768_s12  ;;  %s3773_s19 = sshll.u32 %s3962_s23, 4  ;;  %s3774_s19 = int_to_ptr.vmem [resolvable:$false] %s3773_s19 }
  0x4c   : > { %s3775_s16 = scalar_lea.vmem %s3774_s19, 32  ;;  %p3776_p12 = scmp.lt.s32.totalorder %s4166_s11, %s3774_s19 }
  0x4d   : > { %p3771_p13 = pnand %p3769_p10, %p4180_p1  ;;  %p3777_p8 = scmp.lt.s32.totalorder %s3775_s16, %s3768_s12 }
  0x4f   : > { %p3772_p3 = pneg %p3771_p13  ;;  %p3778_p7 = por %p3777_p8, %p3776_p12 }
  0x51   : > { %p3779_p0 = pnand %p3778_p7, %p3772_p3 }
  0x53   : > { %3782 = shalt.err (!%p3779_p0)
}
  0x54   : > { %3574 = dma.hbm_to_vmem [thread:$0]  (!%p4162_p11), %s4159_s18, 16, %s4166_s11, %s4174_s17  }
  0x55   : > { %s463_s26 = scalar_lea.vmem [#allocation8], %s4145_s14  ;;  %s3963_s21 = smov [#allocation5]  }
  0x56   : > { %s470_s30 = sshll.u32 %s463_s26, 4  ;;  %s401_s12 = sshll.u32 %s3963_s21, 4  ;;  %s4205_s30 = int_to_ptr.vmem [resolvable:$true] %s470_s30  ;;  %s402_s12 = int_to_ptr.vmem [resolvable:$true] %s401_s12 }
  0x57   : > { %s3783_s23 = scalar_lea.hbm %s4172_s25, 16  ;;  %s3788_s6 = scalar_lea.hbm %s4853_s7, 32 }
  0x58   : > { %p3784_p8 = scmp.ne.s32.totalorder %s4172_s25, %s3783_s23  ;;  %p3789_p2 = scmp.lt.u32.totalorder %s4172_s25, %s4853_s7 }
  0x59   : > { %p3790_p5 = scmp.lt.u32.totalorder %s3788_s6, %s3783_s23  ;;  %p3792_p9 = scmp.lt.u32.totalorder %s3783_s23, %s4172_s25 }
  0x5a   : > { %p3786_p12 = pnand %p3784_p8, %p4180_p1 }
  0x5b   : > { %p3791_p6 = por %p3790_p5, %p3789_p2 }
  0x5c   : > { %p3787_p4 = pneg %p3786_p12 }
  0x5d   : > { %p3793_p10 = por %p3792_p9, %p3791_p6 }
  0x5f   : > { %p3794_p13 = pnand %p3793_p10, %p3787_p4 }
  0x61   : > { %3797 = shalt.err (!%p3794_p13)
}
  0x62   : > { %s3798_s18 = scalar_lea.vmem %s4205_s30, 16  ;;  %s3964_s11 = smov [#allocation8]  }
  0x63   : > { %p3799_p3 = scmp.ne.s32.totalorder %s4205_s30, %s3798_s18  ;;  %s3803_s26 = sshll.u32 %s3964_s11, 4  ;;  %s3804_s26 = int_to_ptr.vmem [resolvable:$false] %s3803_s26 }
  0x64   : > { %s3805_s8 = scalar_lea.vmem %s3804_s26, 32  ;;  %p3806_p8 = scmp.lt.s32.totalorder %s4205_s30, %s3804_s26 }
  0x65   : > { %p3801_p7 = pnand %p3799_p3, %p4180_p1  ;;  %p3807_p12 = scmp.lt.s32.totalorder %s3805_s8, %s3798_s18 }
  0x67   : > { %p3802_p0 = pneg %p3801_p7  ;;  %p3808_p2 = por %p3807_p12, %p3806_p8 }
  0x69   : > { %p3809_p5 = pnand %p3808_p2, %p3802_p0 }
  0x6b   : > { %3812 = shalt.err (!%p3809_p5)
}
  0x6c   : > { %3577 = dma.hbm_to_vmem [thread:$0]  (!%p4162_p11), %s4172_s25, 16, %s4205_s30, %s4174_s17  }
  0x6d   : > { %s4897_s1 = sld [smem:[#allocation21_spill]]  ;;  %p4898_p6 = scmp.ne.s32.totalorder %s4885_s15, 0 }
  0x6f   : > { %p4899_p9 = pneg %p4898_p6 }
  0x73   : > { %s3813_s21 = scalar_lea.hbm %s4897_s1, 256 }
  0x74   : > { %p3814_p4 = scmp.ne.s32.totalorder %s4897_s1, %s3813_s21  ;;  %p3820_p3 = scmp.lt.u32.totalorder %s3813_s21, %s4897_s1 }
  0x76   : > { %p3816_p10 = pnand %p3814_p4, %p4899_p9 }
  0x78   : > { %p3817_p13 = pneg %p3816_p10 }
  0x7a   : > { %p3822_p7 = pnand %p3820_p3, %p3817_p13 }
  0x7c   : > { %3825 = shalt.err (!%p3822_p7)
}
  0x7d   : > { %s3826_s25 = scalar_lea.vmem %s402_s12, 256  ;;  %p4900_p8 = pmov %p4899_p9 }
  0x7e   : > { %p3827_p0 = scmp.ne.s32.totalorder %s402_s12, %s3826_s25  ;;  %p3834_p5 = scmp.lt.s32.totalorder %s402_s12, %s402_s12 }
  0x7f   : > { %p3835_p11 = scmp.lt.s32.totalorder %s3826_s25, %s3826_s25 }
  0x80   : > { %p3829_p12 = pnand %p3827_p0, %p4900_p8 }
  0x81   : > { %p3836_p1 = por %p3835_p11, %p3834_p5 }
  0x82   : > { %p3830_p2 = pneg %p3829_p12 }
  0x84   : > { %p3837_p4 = pnand %p3836_p1, %p3830_p2 }
  0x86   : > { %3840 = shalt.err (!%p3837_p4)
}
  0x87   : > { %s3965_s30 = smov 128   ;;  %s3966_s11 = smov 8  }
  0x88   : > { %3570 = dma.hbm_to_vmem [thread:$0]  (!%p4898_p6), %s4897_s1, 256, %s402_s12, [#allocation6], %s3965_s30, %s3965_s30, %s3966_s11  }
  0x89   : > { %s4253_s21 = scalar_lea.hbm %s4855_s9, %s4148_s20  ;;  %s488_s23 = scalar_lea.vmem [#allocation9], %s4145_s14 }
  0x8a   : > { %s495_s19 = sshll.u32 %s488_s23, 4  ;;  %s3841_s16 = scalar_lea.hbm %s4253_s21, 16  ;;  %s496_s19 = int_to_ptr.vmem [resolvable:$true] %s495_s19 }
  0x8b   : > { %p3842_p11 = scmp.ne.s32.totalorder %s4253_s21, %s3841_s16  ;;  %p4901_p1 = scmp.ne.s32.totalorder %s4896_s13, 0 }
  0x8c   : > { %s3846_s12 = scalar_lea.hbm %s4855_s9, 32  ;;  %p3847_p6 = scmp.lt.u32.totalorder %s4253_s21, %s4855_s9 }
  0x8d   : > { %p3844_p9 = pnand %p3842_p11, %p4901_p1  ;;  %p3848_p13 = scmp.lt.u32.totalorder %s3846_s12, %s3841_s16 }
  0x8e   : > { %p3850_p7 = scmp.lt.u32.totalorder %s3841_s16, %s4253_s21 }
  0x8f   : > { %p3845_p10 = pneg %p3844_p9  ;;  %p3849_p3 = por %p3848_p13, %p3847_p6 }
  0x91   : > { %p3851_p0 = por %p3850_p7, %p3849_p3 }
  0x93   : > { %p3852_p8 = pnand %p3851_p0, %p3845_p10 }
  0x95   : > { %3855 = shalt.err (!%p3852_p8)
}
  0x96   : > { %s3856_s14 = scalar_lea.vmem %s496_s19, 16  ;;  %s3967_s20 = smov [#allocation9]  }
  0x97   : > { %p3857_p12 = scmp.ne.s32.totalorder %s496_s19, %s3856_s14  ;;  %s3861_s11 = sshll.u32 %s3967_s20, 4  ;;  %s3862_s11 = int_to_ptr.vmem [resolvable:$false] %s3861_s11 }
  0x98   : > { %s3863_s26 = scalar_lea.vmem %s3862_s11, 32  ;;  %p3864_p4 = scmp.lt.s32.totalorder %s496_s19, %s3862_s11 }
  0x99   : > { %p3859_p2 = pnand %p3857_p12, %p4901_p1  ;;  %p3865_p11 = scmp.lt.s32.totalorder %s3863_s26, %s3856_s14 }
  0x9b   : > { %p3860_p5 = pneg %p3859_p2  ;;  %p3866_p9 = por %p3865_p11, %p3864_p4 }
  0x9d   : > { %p3867_p6 = pnand %p3866_p9, %p3860_p5 }
  0x9f   : > { %3870 = shalt.err (!%p3867_p6)
}
  0xa0   : > { %p4902_p13 = scmp.ne.s32.totalorder %s4895_s0, 0  ;;  %p4903_p10 = scmp.ne.s32.totalorder %s4884_s29, 0 }
  0xa1   : > { %p4904_p1 = scmp.eq.s32.totalorder (!%p4903_p10), %s4076_s27, 0 }
  0xa2   : > { %3580 = dma.hbm_to_vmem [thread:$0]  (!%p4902_p13), %s4253_s21, 16, %s496_s19, %s4174_s17  }
  0xa3   : > { %518 = sbr.rel (%p4903_p10) target bundleno = 2955 (0xb8b), region = 68 }
  0xaa   : > { %3922 = dma.done.wait (%p4904_p1), [#allocation3], 128   ;;  %p4905_p3 = pmov %p4904_p1 }
  0xab   : > { %p4906_p7 = pmov %p4904_p1 }
  0xac   : > { %3924 = vsyncadd (%p4905_p3), [#allocation3], 4294967168 }
  0xad   : > { %3926 = dma.done.wait (%p4906_p7), [#allocation6], 256   ;;  %p4907_p0 = pmov %p4904_p1 }
  0xae   : > { %s528_s0 = sand.u32 1, %s4076_s27   ;;  %s4286_s13 = sand.u32 1, %s3943_s22  }
  0xaf   : > { %3928 = vsyncadd (%p4907_p0), [#allocation6], 4294967040  ;;  %s529_s29 = scalar_lea.sflag [#allocation3], %s528_s0  ;;  %p4908_p8 = scmp.ne.s32.totalorder %s4883_s28, 0 }
  0xb1   : > { %3930 = dma.done.wait (%p4908_p8), %s529_s29, 48  }
  0xb2   : > { %3932 = vsyncadd (%p4908_p8), %s529_s29, 4294967248  ;;  %p620_p12 = scmp.lt.s32.totalorder %s3951_s24, 1  ;;  %s4909_s0 = sld [smem:[#allocation23_spill]] }
  0xb3   : > { %s4910_s23 = sld [smem:[#allocation24_spill]]  ;;  %s4911_s18 = sld [smem:[#allocation25_spill]] }
  0xb4   : > { %s4295_s8 = scalar_select %p620_p12, %s3951_s24, 1 }
  0xb5   : > { %s539_s21 = scalar_lea.vmem [#allocation8], %s4286_s13  ;;  %s547_s1 = scalar_lea.vmem [#allocation9], %s4286_s13 }
  0xb6   : > { %s3364_s16 = sshll.u32 %s4295_s8, 4  ;;  %s3367_s15 = sshll.u32 %s4295_s8, 5 }
  0xb7   : > { %s4310_s25 = scalar_lea.vmem %s4850_s4, %s3364_s16  ;;  %s4315_s20 = scalar_lea.vmem %s4851_s5, %s3364_s16 }
  0xb8   : > { %s4320_s29 = scalar_lea.vmem %s4909_s0, %s3364_s16  ;;  %p3307_p2 = scmp.ne.s32.totalorder %s3951_s24, 0 }
  0xb9   : > { %s4325_s19 = scalar_lea.vmem %s4910_s23, %s3367_s15  ;;  %s648_s12 = scalar_lea.vmem %s4911_s18, %s4295_s8  ;;  %v655_v0 = vld [vmem:[#allocation5] sm:$0xff] (!%p3307_p2)  ;;  %vm657_vm0 = vcmask (!%p3307_p2), 261120   ;;  %v656_v1 = vld [vmem:[#allocation5 + $0x8] sm:$0xff] (!%p3307_p2) }
  0xba   : > { %654 = sbr.rel (%p3307_p2) target bundleno = 193 (0xc1), region = 92  ;;  %658 = vst.msk [vmem:[#allocation10] sm:$0xff] (!%p3307_p2), %vm657_vm0, %v655_v0  ;;  %659 = vst.msk [vmem:[#allocation10 + $0x8] sm:$0xff] (!%p3307_p2), %vm657_vm0, %v656_v1 }
  0xc1 PF: > { %v660_v2 = vld [vmem:[#allocation10] sm:$0xff]  ;;  %vm664_vm1 = vcmask 261120   ;;  %v661_v3 = vld [vmem:[#allocation10 + $0x8] sm:$0xff]  ;;  %v3968_v17 = vmov 0.0   ;;  %vm3969_vm2 = vmmov 0   ;;  %s4912_s28 = scalar_lea.vmem %s4848_s2, %s4295_s8  ;;  %s3970_s30 = smov 112   ;;  %v794_v48 = vlaneseq }
  0xc2   : > { %v665_v4 = vsel %vm664_vm1, %v660_v2, 0.0  ;;  %v668_v5 = vsel %vm664_vm1, %v661_v3, 0.0  ;;  %v3669_v16 = vld [vmem:[%s4310_s25] sm:$0xff]   ;;  %3414 = vmatprep.subr.bf16.mxu0 %v3968_v17  ;;  %3422 = vmatprep.subr.bf16.mxu1 %v3968_v17  ;;  %v3670_v18 = vld [vmem:[%s4310_s25 + $0x8] sm:$0xff]   ;;  %s4913_s25 = scalar_lea.vmem %s4849_s3, %s4295_s8  ;;  %s3971_s14 = smov 120   ;;  %vm1670_vm3 = vcmask 64512  }
  0xc3   : > { %666 = vadd.xlane.f32.xlu0 %v665_v4  ;;  %3415 = vmatpush3.bf16.msra.mxu0 %v3669_v16  ;;  %v3308_v27 = vld [vmem:[%s4912_s28] ss:$0 sm:$0xff]  ;;  %s3972_s11 = smov 104   ;;  %s3973_s26 = smov 96   ;;  %v3974_v46 = vmov 1983009808  }
  0xc4   : > { %3418 = vmatprep.mubr.msk.bf16.mxu0 %vm3969_vm2, %v3968_v17  ;;  %3416 = vmatprep.subr.bf16.mxu0 %v3968_v17  ;;  %v3309_v31 = vld [vmem:[%s4913_s25] ss:$0 sm:$0xff]  ;;  %v792_v47 = vunpack.c.l.s4 %v3974_v46  ;;  %v795_v50 = vshrl.u32 %v794_v48, 7  ;;  %v3975_v51 = vmov 1934713408   ;;  %s3976_s0 = smov 64  }
  0xc5   : > { %3424 = vmatprep.mubr.msk.bf16.mxu1 %vm3969_vm2, %v3968_v17  ;;  %v824_v52 = vunpack.c.l.s4 %v3975_v51  ;;  %vm2146_vm4 = vcmask 1043456   ;;  %s3977_s6 = smov 16   ;;  %s3979_s10 = smov 24   ;;  %vm2810_vm5 = vcmask 130048   ;;  %vm2813_vm6 = vcmask 195584  }
  0xc6   : > { %v793_v49 = vunpack.c.0.s8 %v792_v47  ;;  %s4914_s23 = scalar_lea.vmem [#allocation7], %s4286_s13  ;;  %vm3039_vm7 = vcmask 523264   ;;  %p3586_p5 = scmp.eq.s32.totalorder %s4076_s27, 1 }
  0xc7   : > { %669 = vadd.xlane.f32.xlu0 %v668_v5  ;;  %3417 = vmatpush3.bf16.msra.mxu0 %v3670_v18  ;;  %v825_v58 = vunpack.c.0.s8 %v824_v52 }
  0xc8   : > { %3428 = vmatprep.subr.bf16.mxu0 %v3968_v17  ;;  %v4395_v55 = vsub.s32 %v793_v49, %v795_v50 }
  0xc9   : > { %v4405_v63 = vsub.s32 %v825_v58, %v795_v50 }
 0x150   : > { %v667_v6 = vpop.xlane.xlu0 %666 }
 0x151   : > { %v672_v7 = vmul.f32 0.03125, %v667_v6 }
 0x153   : > { %v674_v8 = vsub.f32 %v660_v2, %v672_v7 }
 0x154   : > { %v670_v9 = vpop.xlane.xlu0 %669 }
 0x155   : > { %v673_v10 = vmul.f32 0.03125, %v670_v9  ;;  %v676_v11 = vmul.f32 %v674_v8, %v674_v8 }
 0x157   : > { %v675_v12 = vsub.f32 %v661_v3, %v673_v10  ;;  %v678_v13 = vsel %vm664_vm1, %v676_v11, 0.0 }
 0x158   : > { %679 = vadd.xlane.f32.xlu1 %v678_v13 }
 0x159   : > { %v677_v14 = vmul.f32 %v675_v12, %v675_v12 }
 0x15b   : > { %v681_v15 = vsel %vm664_vm1, %v677_v14, 0.0 }
 0x15c   : > { %682 = vadd.xlane.f32.xlu1 %v681_v15 }
 0x1e5   : > { %v680_v19 = vpop.xlane.xlu1 %679 }
 0x1e6   : > { %v684_v20 = vmul.f32 0.03125, %v680_v19 }
 0x1e8   : > { %v686_v21 = vadd.f32 1e-05, %v684_v20 }
 0x1e9   : > { %v683_v22 = vpop.xlane.xlu1 %682 }
 0x1ea   : > { %3679 = vrsqrt.f32 %v686_v21  ;;  %v685_v23 = vmul.f32 0.03125, %v683_v22 }
 0x1ec   : > { %v687_v24 = vadd.f32 1e-05, %v685_v23 }
 0x1ee   : > { %3681 = vrsqrt.f32 %v687_v24 }
 0x1f4   : > { %v3680_v25 = vpop.eup %3679 }
 0x1f5   : > { %v690_v26 = vmul.f32 %v3680_v25, %v674_v8 }
 0x1f7   : > { %v698_v30 = vmul.f32 %v3308_v27, %v690_v26 }
 0x1f8   : > { %v3682_v28 = vpop.eup %3681 }
 0x1f9   : > { %v691_v29 = vmul.f32 %v3682_v28, %v675_v12  ;;  %v706_v33 = vadd.f32 %v3309_v31, %v698_v30 }
 0x1fb   : > { %v699_v32 = vmul.f32 %v3308_v27, %v691_v29 }
 0x1fd   : > { %v707_v34 = vadd.f32 %v3309_v31, %v699_v32 }
 0x1ff   : > { %v708_v35 = vpack.c.bf16 %v707_v34, %v706_v33 }
 0x201   : > { %3419 = vmatmul.mubr.msk.bf16.vlgmr.msra.gmra.mrb[0].mxu0 %vm664_vm1, %v708_v35 }
 0x202   : > { %3430 = vmatprep.mubr.msk.bf16.mxu0 %vm3969_vm2, %v3968_v17 }
 0x2d4   : > { %v4361_v36 = vpop.f32.mrb[0].mxu0 }
 0x2d5   : > { %777 = vrot.lane.b32.xlu1 %v4361_v36, %s3970_s30  ;;  %771 = vrot.lane.b32.xlu0 %v4361_v36, %s3971_s14  ;;  %v3420_v37 = vpop.f32.mrb[1].mxu0 }
 0x2d6   : > { %v4365_v38 = vpop.f32.mrb[2].mxu0 }
 0x2d7   : > { %v3421_v39 = vpop.f32.mrb[3].mxu0 }
 0x2d9   : > { %783 = vrot.lane.b32.xlu1 %v4361_v36, %s3972_s11  ;;  %779 = vrot.lane.b32.xlu0 %v4365_v38, %s3970_s30 }
 0x2dd   : > { %1061 = vrot.lane.b32.xlu0 %v4361_v36, %s3973_s26  ;;  %773 = vrot.lane.b32.xlu1 %v4365_v38, %s3971_s14 }
 0x2e1   : > { %785 = vrot.lane.b32.xlu1 %v4365_v38, %s3972_s11 }
 0x347   : > { %v4372_v40 = vpop.permute.xlu1 %777  ;;  %v4374_v41 = vpop.permute.xlu0 %771 }
 0x348   : > { %1069 = vrot.lane.b32.xlu0 %v4372_v40, %s3973_s26  ;;  %1065 = vrot.lane.b32.xlu1 %v4374_v41, %s3973_s26  ;;  %v789_v56 = vcombine.low %v4361_v36, %v4372_v40  ;;  %v790_v57 = vcombine.high %v4361_v36, %v4372_v40 }
 0x34a   : > { %v797_v61 = vrot.slane %v789_v56, %v4395_v55  ;;  %v804_v62 = vrot.slane %v790_v57, %v4395_v55 }
 0x34b   : > { %v4378_v42 = vpop.permute.xlu1 %783  ;;  %v4382_v43 = vpop.permute.xlu0 %779 }
 0x34c   : > { %1063 = vrot.lane.b32.xlu0 %v4365_v38, %s3973_s26  ;;  %1073 = vrot.lane.b32.xlu1 %v4378_v42, %s3973_s26  ;;  %v805_v53 = vcombine.low %v4374_v41, %v4378_v42  ;;  %v806_v54 = vcombine.high %v4374_v41, %v4378_v42  ;;  %v857_v15 = vcombine.low %v4365_v38, %v4382_v43 }
 0x34d   : > { %v858_v16 = vcombine.high %v4365_v38, %v4382_v43 }
 0x34e   : > { %v813_v59 = vrot.slane %v805_v53, %v4395_v55  ;;  %v820_v60 = vrot.slane %v806_v54, %v4395_v55  ;;  %v865_v30 = vrot.slane %v857_v15, %v4395_v55 }
 0x34f   : > { %v4384_v44 = vpop.permute.xlu1 %773  ;;  %v1062_v4 = vpop.permute.xlu0 %1061  ;;  %v4433_v31 = vrot.slane %v858_v16, %v4395_v55 }
 0x350   : > { %1071 = vrot.lane.b32.xlu0 %v4382_v43, %s3973_s26  ;;  %1067 = vrot.lane.b32.xlu1 %v4384_v44, %s3973_s26  ;;  %v821_v0 = vcombine.low %v797_v61, %v813_v59  ;;  %v822_v1 = vcombine.high %v797_v61, %v813_v59  ;;  %v837_v2 = vcombine.low %v804_v62, %v820_v60 }
 0x351   : > { %v838_v3 = vcombine.high %v804_v62, %v820_v60 }
 0x352   : > { %v829_v5 = vrot.slane %v821_v0, %v4405_v63  ;;  %v836_v6 = vrot.slane %v822_v1, %v4405_v63  ;;  %v845_v7 = vrot.slane %v837_v2, %v4405_v63 }
 0x353   : > { %v4388_v45 = vpop.permute.xlu1 %785  ;;  %v852_v8 = vrot.slane %v838_v3, %v4405_v63 }
 0x354   : > { %1075 = vrot.lane.b32.xlu1 %v4388_v45, %s3973_s26  ;;  %v925_v11 = vcombine.low %v829_v5, %v836_v6  ;;  %v3313_v12 = vcombine.high %v829_v5, %v836_v6  ;;  %v873_v18 = vcombine.low %v4384_v44, %v4388_v45  ;;  %v874_v19 = vcombine.high %v4384_v44, %v4388_v45 }
 0x355   : > { %v941_v13 = vcombine.low %v845_v7, %v852_v8  ;;  %v3314_v14 = vcombine.high %v845_v7, %v852_v8 }
 0x356   : > { %v4420_v24 = vrot.slane %v925_v11, %v4395_v55  ;;  %v4423_v25 = vrot.slane %v3313_v12, %v4395_v55  ;;  %v881_v32 = vrot.slane %v873_v18, %v4395_v55  ;;  %v4437_v33 = vrot.slane %v874_v19, %v4395_v55 }
 0x357   : > { %v4426_v26 = vrot.slane %v941_v13, %v4395_v55  ;;  %v4429_v27 = vrot.slane %v3314_v14, %v4395_v55 }
 0x358   : > { %v957_v47 = vcombine.low %v4420_v24, %v4423_v25  ;;  %v958_v48 = vcombine.high %v4420_v24, %v4423_v25  ;;  %v889_v57 = vcombine.low %v865_v30, %v881_v32  ;;  %v890_v58 = vcombine.high %v865_v30, %v881_v32 }
 0x359   : > { %v973_v49 = vcombine.low %v4426_v26, %v4429_v27  ;;  %v974_v50 = vcombine.high %v4426_v26, %v4429_v27  ;;  %v905_v59 = vcombine.low %v4433_v31, %v4437_v33  ;;  %v906_v60 = vcombine.high %v4433_v31, %v4437_v33 }
 0x35a   : > { %v965_v5 = vrot.slane %v957_v47, %v4405_v63  ;;  %v4462_v11 = vrot.slane %v889_v57, %v4405_v63  ;;  %v4465_v12 = vrot.slane %v890_v58, %v4405_v63 }
 0x35b   : > { %v981_v6 = vrot.slane %v973_v49, %v4405_v63 }
 0x3ba   : > { %v1070_v9 = vpop.permute.xlu0 %1069  ;;  %v1066_v10 = vpop.permute.xlu1 %1065 }
 0x3bb   : > { %v1085_v20 = vcombine.low %v1062_v4, %v1070_v9  ;;  %v1086_v21 = vcombine.high %v1062_v4, %v1070_v9 }
 0x3bd   : > { %v1093_v34 = vrot.slane %v1085_v20, %v4395_v55  ;;  %v1100_v35 = vrot.slane %v1086_v21, %v4395_v55 }
 0x3be   : > { %v1064_v22 = vpop.permute.xlu0 %1063  ;;  %v1074_v23 = vpop.permute.xlu1 %1073 }
 0x3bf   : > { %v1101_v28 = vcombine.low %v1066_v10, %v1074_v23  ;;  %v1102_v29 = vcombine.high %v1066_v10, %v1074_v23 }
 0x3c1   : > { %v1109_v37 = vrot.slane %v1101_v28, %v4395_v55  ;;  %v1116_v39 = vrot.slane %v1102_v29, %v4395_v55 }
 0x3c2   : > { %v1068_v46 = vpop.permute.xlu1 %1067  ;;  %v1072_v56 = vpop.permute.xlu0 %1071 }
 0x3c3   : > { %v1117_v51 = vcombine.low %v1093_v34, %v1109_v37  ;;  %v1118_v52 = vcombine.high %v1093_v34, %v1109_v37  ;;  %v1133_v53 = vcombine.low %v1100_v35, %v1116_v39  ;;  %v1134_v54 = vcombine.high %v1100_v35, %v1116_v39 }
 0x3c4   : > { %v1153_v2 = vcombine.low %v1064_v22, %v1072_v56  ;;  %v1154_v3 = vcombine.high %v1064_v22, %v1072_v56  ;;  %v920_v56 = vrot.slane %v906_v60, %v4405_v63 }
 0x3c5   : > { %v1125_v61 = vrot.slane %v1117_v51, %v4405_v63  ;;  %v1132_v62 = vrot.slane %v1118_v52, %v4405_v63  ;;  %v1141_v0 = vrot.slane %v1133_v53, %v4405_v63  ;;  %v1148_v1 = vrot.slane %v1134_v54, %v4405_v63 }
 0x3c6   : > { %v1076_v4 = vpop.permute.xlu1 %1075  ;;  %v1161_v20 = vrot.slane %v1153_v2, %v4395_v55  ;;  %v1168_v21 = vrot.slane %v1154_v3, %v4395_v55  ;;  %v913_v54 = vrot.slane %v905_v59, %v4405_v63 }
 0x3c7   : > { %v1221_v7 = vcombine.low %v1125_v61, %v1132_v62  ;;  %v3317_v8 = vcombine.high %v1125_v61, %v1132_v62  ;;  %v1237_v9 = vcombine.low %v1141_v0, %v1148_v1  ;;  %v3318_v10 = vcombine.high %v1141_v0, %v1148_v1 }
 0x3c8   : > { %v1169_v13 = vcombine.low %v1068_v46, %v1076_v4  ;;  %v1170_v14 = vcombine.high %v1068_v46, %v1076_v4  ;;  %v989_v4 = vcombine.low %v965_v5, %v981_v6 }
 0x3c9   : > { %v1228_v15 = vrot.slane %v1221_v7, %v4395_v55  ;;  %v1236_v16 = vrot.slane %v3317_v8, %v4395_v55  ;;  %v1244_v18 = vrot.slane %v1237_v9, %v4395_v55  ;;  %v1252_v19 = vrot.slane %v3318_v10, %v4395_v55 }
 0x3ca   : > { %v1177_v22 = vrot.slane %v1169_v13, %v4395_v55  ;;  %v1184_v23 = vrot.slane %v1170_v14, %v4395_v55  ;;  %v990_v14 = vcombine.high %v965_v5, %v981_v6 }
 0x3cb   : > { %v1253_v28 = vcombine.low %v1228_v15, %v1236_v16  ;;  %v1269_v29 = vcombine.low %v1244_v18, %v1252_v19  ;;  %v1254_v30 = vcombine.high %v1228_v15, %v1236_v16  ;;  %v1270_v31 = vcombine.high %v1244_v18, %v1252_v19 }
 0x3cc   : > { %v1185_v32 = vcombine.low %v1161_v20, %v1177_v22  ;;  %v1186_v33 = vcombine.high %v1161_v20, %v1177_v22  ;;  %v1201_v34 = vcombine.low %v1168_v21, %v1184_v23  ;;  %v1202_v35 = vcombine.high %v1168_v21, %v1184_v23 }
 0x3cd   : > { %v1261_v37 = vrot.slane %v1253_v28, %v4405_v63  ;;  %v1277_v39 = vrot.slane %v1269_v29, %v4405_v63  ;;  %v1268_v46 = vrot.slane %v1254_v30, %v4405_v63  ;;  %v1284_v47 = vrot.slane %v1270_v31, %v4405_v63 }
 0x3ce   : > { %v1193_v49 = vrot.slane %v1185_v32, %v4405_v63  ;;  %v1200_v51 = vrot.slane %v1186_v33, %v4405_v63  ;;  %v1209_v52 = vrot.slane %v1201_v34, %v4405_v63  ;;  %v1216_v53 = vrot.slane %v1202_v35, %v4405_v63 }
 0x3cf   : > { %v1285_v57 = vcombine.low %v1261_v37, %v1277_v39  ;;  %v1286_v58 = vcombine.high %v1261_v37, %v1277_v39  ;;  %v1287_v7 = vcombine.low %v1268_v46, %v1284_v47  ;;  %v1288_v15 = vcombine.high %v1268_v46, %v1284_v47 }
 0x3d0   : > { %v1289_v61 = vcombine.low %v1193_v49, %v1200_v51  ;;  %v3319_v62 = vcombine.high %v1193_v49, %v1200_v51  ;;  %v1305_v0 = vcombine.low %v1209_v52, %v1216_v53  ;;  %v3320_v1 = vcombine.high %v1209_v52, %v1216_v53 }
 0x3d1   : > { %v1661_v2 = vpack.c.bf16 %v1285_v57, %v1285_v57  ;;  %v1662_v3 = vpack.c.bf16 %v1286_v58, %v1286_v58  ;;  %v993_v16 = vcombine.low %v4462_v11, %v4465_v12  ;;  %v3315_v20 = vcombine.high %v4462_v11, %v4465_v12 }
 0x3d2   : > { %v1296_v8 = vrot.slane %v1289_v61, %v4395_v55  ;;  %v1304_v9 = vrot.slane %v3319_v62, %v4395_v55  ;;  %v1312_v10 = vrot.slane %v1305_v0, %v4395_v55  ;;  %v1320_v59 = vrot.slane %v3320_v1, %v4395_v55 }
 0x3d3   : > { %v1675_v60 = vsel %vm1670_vm3, %v1661_v2, 0  ;;  %v1721_v13 = vsel %vm1670_vm3, %v1662_v3, 0  ;;  %v1009_v21 = vcombine.low %v913_v54, %v920_v56  ;;  %v3316_v22 = vcombine.high %v913_v54, %v920_v56 }
 0x3d4   : > { %3423 = vmatpush3.bf16.xpose.msra.mxu1 %v1675_v60  ;;  %3429 = vmatpush3.bf16.xpose.msra.mxu0 %v1721_v13  ;;  %v1321_v18 = vcombine.low %v1296_v8, %v1304_v9  ;;  %v1337_v19 = vcombine.low %v1312_v10, %v1320_v59  ;;  %v1663_v23 = vpack.c.bf16 %v1287_v7, %v1287_v7 }
 0x3d5   : > { %3434 = vmatprep.subr.bf16.mxu1 %v3968_v17  ;;  %3440 = vmatprep.subr.bf16.mxu0 %v3968_v17  ;;  %v1664_v28 = vpack.c.bf16 %v1288_v15, %v1288_v15  ;;  %v1653_v29 = vpack.c.bf16 %v989_v4, %v989_v4  ;;  %v1654_v30 = vpack.c.bf16 %v990_v14, %v990_v14 }
 0x3d6   : > { %v1329_v5 = vrot.slane %v1321_v18, %v4405_v63  ;;  %v1345_v6 = vrot.slane %v1337_v19, %v4405_v63  ;;  %v972_v31 = vrot.slane %v958_v48, %v4405_v63  ;;  %v988_v11 = vrot.slane %v974_v50, %v4405_v63 }
 0x3d7   : > { %v1000_v12 = vrot.slane %v993_v16, %v4395_v55  ;;  %v1008_v32 = vrot.slane %v3315_v20, %v4395_v55  ;;  %v1016_v33 = vrot.slane %v1009_v21, %v4395_v55  ;;  %v1024_v34 = vrot.slane %v3316_v22, %v4395_v55  ;;  %v1669_v20 = vld [vmem:[#allocation2] sm:$0xff] }
 0x3d8   : > { %v1767_v35 = vsel %vm1670_vm3, %v1663_v23, 0  ;;  %v1322_v37 = vcombine.high %v1296_v8, %v1304_v9  ;;  %v1813_v24 = vsel %vm1670_vm3, %v1664_v28, 0  ;;  %v1353_v25 = vcombine.low %v1329_v5, %v1345_v6 }
 0x3d9   : > { %v1354_v26 = vcombine.high %v1329_v5, %v1345_v6  ;;  %v1338_v27 = vcombine.high %v1312_v10, %v1320_v59  ;;  %v991_v48 = vcombine.low %v972_v31, %v988_v11  ;;  %v992_v50 = vcombine.high %v972_v31, %v988_v11 }
 0x3da   : > { %v1025_v39 = vcombine.low %v1000_v12, %v1008_v32  ;;  %v1041_v46 = vcombine.low %v1016_v33, %v1024_v34  ;;  %v1665_v47 = vpack.c.bf16 %v1353_v25, %v1353_v25  ;;  %v1336_v51 = vrot.slane %v1322_v37, %v4405_v63 }
 0x3db   : > { %3425 = vmatmul.mubr.msk.bf16.vlgmr.msra.gmra.mrb[0].mxu1 %vm1670_vm3, %v1653_v29  ;;  %3431 = vmatmul.mubr.msk.bf16.vlgmr.msra.gmra.mrb[4].mxu0 %vm1670_vm3, %v1654_v30  ;;  %v1666_v49 = vpack.c.bf16 %v1354_v26, %v1354_v26  ;;  %v1352_v52 = vrot.slane %v1338_v27, %v4405_v63  ;;  %v1655_v53 = vpack.c.bf16 %v991_v48, %v991_v48 }
 0x3dc   : > { %3435 = vmatpush3.bf16.xpose.msra.mxu1 %v1767_v35  ;;  %3441 = vmatpush3.bf16.xpose.msra.mxu0 %v1813_v24  ;;  %v1656_v54 = vpack.c.bf16 %v992_v50, %v992_v50  ;;  %v1033_v56 = vrot.slane %v1025_v39, %v4405_v63  ;;  %v1049_v57 = vrot.slane %v1041_v46, %v4405_v63  ;;  %v1859_v58 = vsel %vm1670_vm3, %v1665_v47, 0 }
 0x3dd   : > { %3436 = vmatprep.mubr.msk.bf16.mxu1 %vm3969_vm2, %v3968_v17  ;;  %3442 = vmatprep.mubr.msk.bf16.mxu0 %vm3969_vm2, %v3968_v17  ;;  %v1905_v61 = vsel %vm1670_vm3, %v1666_v49, 0  ;;  %v1355_v62 = vcombine.low %v1336_v51, %v1352_v52  ;;  %v1356_v0 = vcombine.high %v1336_v51, %v1352_v52  ;;  %v1026_v1 = vcombine.high %v1000_v12, %v1008_v32 }
 0x3de   : > { %3446 = vmatprep.subr.bf16.mxu1 %v3968_v17  ;;  %3452 = vmatprep.subr.bf16.mxu0 %v3968_v17  ;;  %v1057_v2 = vcombine.low %v1033_v56, %v1049_v57  ;;  %v1058_v3 = vcombine.high %v1033_v56, %v1049_v57  ;;  %v1042_v4 = vcombine.high %v1016_v33, %v1024_v34 }
 0x3df   : > { %v1667_v7 = vpack.c.bf16 %v1355_v62, %v1355_v62  ;;  %v1668_v8 = vpack.c.bf16 %v1356_v0, %v1356_v0  ;;  %v1040_v59 = vrot.slane %v1026_v1, %v4405_v63 }
 0x3e0   : > { %v1657_v9 = vpack.c.bf16 %v1057_v2, %v1057_v2  ;;  %v1658_v10 = vpack.c.bf16 %v1058_v3, %v1058_v3  ;;  %v1056_v60 = vrot.slane %v1042_v4, %v4405_v63 }
 0x3e1   : > { %v1951_v13 = vsel %vm1670_vm3, %v1667_v7, 0  ;;  %v1997_v14 = vsel %vm1670_vm3, %v1668_v8, 0 }
 0x3e2   : > { %v1059_v15 = vcombine.low %v1040_v59, %v1056_v60  ;;  %v1060_v16 = vcombine.high %v1040_v59, %v1056_v60 }
 0x3e3   : > { %3437 = vmatmul.mubr.msk.bf16.vlgmr.msra.gmra.mrb[4].mxu1 %vm1670_vm3, %v1655_v53  ;;  %3443 = vmatmul.mubr.msk.bf16.vlgmr.msra.gmra.mrb[8].mxu0 %vm1670_vm3, %v1656_v54 }
 0x3e4   : > { %3447 = vmatpush3.bf16.xpose.msra.mxu1 %v1859_v58  ;;  %3453 = vmatpush3.bf16.xpose.msra.mxu0 %v1905_v61  ;;  %v1659_v18 = vpack.c.bf16 %v1059_v15, %v1059_v15  ;;  %v1660_v19 = vpack.c.bf16 %v1060_v16, %v1060_v16 }
 0x3e5   : > { %3448 = vmatprep.mubr.msk.bf16.mxu1 %vm3969_vm2, %v3968_v17  ;;  %3454 = vmatprep.mubr.msk.bf16.mxu0 %vm3969_vm2, %v3968_v17 }
 0x3e6   : > { %3458 = vmatprep.subr.bf16.mxu1 %v3968_v17  ;;  %3464 = vmatprep.subr.bf16.mxu0 %v3968_v17 }
 0x3eb   : > { %3449 = vmatmul.mubr.msk.bf16.vlgmr.msra.gmra.mrb[8].mxu1 %vm1670_vm3, %v1657_v9  ;;  %3455 = vmatmul.mubr.msk.bf16.vlgmr.msra.gmra.mrb[12].mxu0 %vm1670_vm3, %v1658_v10 }
 0x3ec   : > { %3459 = vmatpush3.bf16.xpose.msra.mxu1 %v1951_v13  ;;  %3465 = vmatpush3.bf16.xpose.msra.mxu0 %v1997_v14 }
 0x3ed   : > { %3460 = vmatprep.mubr.msk.bf16.mxu1 %vm3969_vm2, %v3968_v17  ;;  %3466 = vmatprep.mubr.msk.bf16.mxu0 %vm3969_vm2, %v3968_v17 }
 0x3ee   : > { %3470 = vmatprep.subr.bf16.mxu1 %v3968_v17  ;;  %3476 = vmatprep.subr.bf16.mxu0 %v3968_v17 }
 0x3f3   : > { %3461 = vmatmul.mubr.msk.bf16.vlgmr.msra.gmra.mrb[12].mxu1 %vm1670_vm3, %v1659_v18  ;;  %3467 = vmatmul.mubr.msk.bf16.vlgmr.msra.gmra.mrb[16].mxu0 %vm1670_vm3, %v1660_v19 }
 0x3f4   : > { %3472 = vmatprep.mubr.msk.bf16.mxu1 %vm3969_vm2, %v3968_v17  ;;  %3478 = vmatprep.mubr.msk.bf16.mxu0 %vm3969_vm2, %v3968_v17 }
 0x4ae   : > { %v1711_v21 = vpop.f32.mrb[0].mxu1  ;;  %v1757_v22 = vpop.f32.mrb[4].mxu0 }
 0x4af   : > { %v4553_v23 = vadd.f32 %v1711_v21, %v1669_v20  ;;  %v4555_v28 = vadd.f32 %v1757_v22, %v1669_v20  ;;  %v3426_v5 = vpop.f32.mrb[1].mxu1  ;;  %v3432_v6 = vpop.f32.mrb[5].mxu0 }
 0x4b0   : > { %v1714_v29 = vpop.f32.mrb[2].mxu1  ;;  %v1760_v30 = vpop.f32.mrb[6].mxu0 }
 0x4b1   : > { %v3427_v31 = vpop.f32.mrb[3].mxu1  ;;  %v3433_v11 = vpop.f32.mrb[7].mxu0  ;;  %v2039_v12 = vsel %vm1670_vm3, %v4553_v23, -inf  ;;  %v2042_v32 = vsel %vm1670_vm3, %v4555_v28, -inf }
 0x4b2   : > { %2040 = vmax.xlane.f32.xlu0 %v2039_v12  ;;  %2043 = vmax.xlane.f32.xlu1 %v2042_v32 }
 0x4b6   : > { %v1803_v33 = vpop.f32.mrb[4].mxu1  ;;  %v1849_v34 = vpop.f32.mrb[8].mxu0 }
 0x4b7   : > { %v1804_v35 = vadd.f32 %v1803_v33, %v1669_v20  ;;  %v3438_v37 = vpop.f32.mrb[5].mxu1  ;;  %v3444_v24 = vpop.f32.mrb[9].mxu0  ;;  %v1850_v27 = vadd.f32 %v1849_v34, %v1669_v20 }
 0x4b8   : > { %v1806_v25 = vpop.f32.mrb[6].mxu1  ;;  %v1852_v26 = vpop.f32.mrb[10].mxu0 }
 0x4b9   : > { %v3439_v48 = vpop.f32.mrb[7].mxu1  ;;  %v3445_v50 = vpop.f32.mrb[11].mxu0  ;;  %v2045_v39 = vsel %vm1670_vm3, %v1804_v35, -inf  ;;  %v2048_v46 = vsel %vm1670_vm3, %v1850_v27, -inf }
 0x4ba   : > { %2046 = vmax.xlane.f32.xlu0 %v2045_v39 }
 0x4be   : > { %v1895_v47 = vpop.f32.mrb[8].mxu1  ;;  %2049 = vmax.xlane.f32.xlu0 %v2048_v46  ;;  %v1941_v49 = vpop.f32.mrb[12].mxu0 }
 0x4bf   : > { %v1896_v51 = vadd.f32 %v1895_v47, %v1669_v20  ;;  %v1942_v52 = vadd.f32 %v1941_v49, %v1669_v20  ;;  %v3450_v53 = vpop.f32.mrb[9].mxu1  ;;  %v3456_v54 = vpop.f32.mrb[13].mxu0 }
 0x4c0   : > { %v1898_v56 = vpop.f32.mrb[10].mxu1  ;;  %v1944_v57 = vpop.f32.mrb[14].mxu0 }
 0x4c1   : > { %v3451_v58 = vpop.f32.mrb[11].mxu1  ;;  %v3457_v61 = vpop.f32.mrb[15].mxu0  ;;  %v2051_v62 = vsel %vm1670_vm3, %v1896_v51, -inf  ;;  %v2054_v0 = vsel %vm1670_vm3, %v1942_v52, -inf }
 0x4c2   : > { %2052 = vmax.xlane.f32.xlu0 %v2051_v62  ;;  %2055 = vmax.xlane.f32.xlu1 %v2054_v0 }
 0x4c6   : > { %v1987_v1 = vpop.f32.mrb[12].mxu1  ;;  %v2033_v2 = vpop.f32.mrb[16].mxu0 }
 0x4c7   : > { %v4565_v3 = vadd.f32 %v1987_v1, %v1669_v20  ;;  %v4567_v4 = vadd.f32 %v2033_v2, %v1669_v20  ;;  %v3462_v7 = vpop.f32.mrb[13].mxu1  ;;  %v3468_v8 = vpop.f32.mrb[17].mxu0 }
 0x4c8   : > { %v1990_v9 = vpop.f32.mrb[14].mxu1  ;;  %v2036_v10 = vpop.f32.mrb[18].mxu0 }
 0x4c9   : > { %v3463_v59 = vpop.f32.mrb[15].mxu1  ;;  %v3469_v60 = vpop.f32.mrb[19].mxu0  ;;  %v2057_v13 = vsel %vm1670_vm3, %v4565_v3, -inf  ;;  %v2060_v14 = vsel %vm1670_vm3, %v4567_v4, -inf }
 0x4ca   : > { %2058 = vmax.xlane.f32.xlu0 %v2057_v13 }
 0x4d3   : > { %1361 = vrot.lane.b32.xlu1 %v4374_v41, %s3976_s0 }
 0x4d7   : > { %1365 = vrot.lane.b32.xlu1 %v4372_v40, %s3976_s0 }
 0x4e0   : > { %1357 = vrot.lane.b32.xlu0 %v4361_v36, %s3976_s0 }
 0x4fb   : > { %2061 = vmax.xlane.f32.xlu1 %v2060_v14 }
 0x50c   : > { %1369 = vrot.lane.b32.xlu1 %v4378_v42, %s3976_s0 }
 0x53f   : > { %v2041_v15 = vpop.xlane.xlu0 %2040  ;;  %v2044_v16 = vpop.xlane.xlu1 %2043 }
 0x540   : > { %v2063_v18 = vsub.f32 %v4553_v23, %v2041_v15  ;;  %v2064_v19 = vsub.f32 %v4555_v28, %v2044_v16 }
 0x542   : > { %v2071_v41 = vmul.f32 1.442695, %v2063_v18  ;;  %v2073_v20 = vmul.f32 1.442695, %v2064_v19 }
 0x544   : > { %3683 = vpow2.f32 %v2071_v41 }
 0x545   : > { %3685 = vpow2.f32 %v2073_v20 }
 0x547   : > { %v2047_v40 = vpop.xlane.xlu0 %2046 }
 0x548   : > { %v2065_v21 = vsub.f32 %v1804_v35, %v2047_v40 }
 0x54a   : > { %v2075_v36 = vmul.f32 1.442695, %v2065_v21 }
 0x54b   : > { %v2050_v22 = vpop.xlane.xlu0 %2049 }
 0x54c   : > { %3687 = vpow2.f32 %v2075_v36  ;;  %v2066_v5 = vsub.f32 %v1850_v27, %v2050_v22 }
 0x54e   : > { %v4583_v6 = vpop.eup %3683  ;;  %v2077_v29 = vmul.f32 1.442695, %v2066_v5 }
 0x54f   : > { %v4585_v42 = vpop.eup %3685  ;;  %v2053_v30 = vpop.xlane.xlu0 %2052  ;;  %v2087_v23 = vsel %vm1670_vm3, %v4583_v6, 0.0 }
 0x550   : > { %v2056_v31 = vpop.xlane.xlu1 %2055  ;;  %3689 = vpow2.f32 %v2077_v29  ;;  %v2067_v28 = vsub.f32 %v1896_v51, %v2053_v30  ;;  %2088 = vadd.xlane.f32.xlu0 %v2087_v23  ;;  %v2090_v12 = vsel %vm1670_vm3, %v4585_v42, 0.0 }
 0x551   : > { %v2068_v11 = vsub.f32 %v1942_v52, %v2056_v31  ;;  %2091 = vadd.xlane.f32.xlu1 %v2090_v12 }
 0x552   : > { %v2079_v32 = vmul.f32 1.442695, %v2067_v28 }
 0x553   : > { %v2081_v33 = vmul.f32 1.442695, %v2068_v11 }
 0x554   : > { %3691 = vpow2.f32 %v2079_v32  ;;  %v1362_v50 = vpop.permute.xlu1 %1361 }
 0x555   : > { %3693 = vpow2.f32 %v2081_v33 }
 0x556   : > { %v4591_v34 = vpop.eup %3687 }
 0x557   : > { %v2093_v35 = vsel %vm1670_vm3, %v4591_v34, 0.0  ;;  %v2059_v39 = vpop.xlane.xlu0 %2058 }
 0x558   : > { %2094 = vadd.xlane.f32.xlu0 %v2093_v35  ;;  %v2069_v46 = vsub.f32 %v4565_v3, %v2059_v39  ;;  %v1366_v47 = vpop.permute.xlu1 %1365 }
 0x55a   : > { %v4595_v37 = vpop.eup %3689  ;;  %v2083_v49 = vmul.f32 1.442695, %v2069_v46 }
 0x55b   : > { %v2096_v24 = vsel %vm1670_vm3, %v4595_v37, 0.0  ;;  %v1358_v51 = vpop.permute.xlu0 %1357 }
 0x55c   : > { %2097 = vadd.xlane.f32.xlu1 %v2096_v24  ;;  %3695 = vpow2.f32 %v2083_v49  ;;  %v1382_v54 = vcombine.high %v1358_v51, %v1366_v47 }
 0x55e   : > { %v4599_v25 = vpop.eup %3691  ;;  %v1396_v58 = vrot.slane %v1382_v54, %v4395_v55 }
 0x55f   : > { %v2099_v26 = vsel %vm1670_vm3, %v4599_v25, 0.0  ;;  %v4603_v27 = vpop.eup %3693 }
 0x560   : > { %2100 = vadd.xlane.f32.xlu0 %v2099_v26  ;;  %v2102_v48 = vsel %vm1670_vm3, %v4603_v27, 0.0 }
 0x564   : > { %2103 = vadd.xlane.f32.xlu0 %v2102_v48 }
 0x566   : > { %v4625_v10 = vpop.eup %3695 }
 0x567   : > { %v2105_v20 = vsel %vm1670_vm3, %v4625_v10, 0.0 }
 0x56d   : > { %1363 = vrot.lane.b32.xlu1 %v4384_v44, %s3976_s0  ;;  %v1381_v44 = vcombine.low %v1358_v51, %v1366_v47 }
 0x571   : > { %1367 = vrot.lane.b32.xlu1 %v4382_v43, %s3976_s0 }
 0x575   : > { %1371 = vrot.lane.b32.xlu1 %v4388_v45, %s3976_s0 }
 0x57a   : > { %1359 = vrot.lane.b32.xlu0 %v4365_v38, %s3976_s0  ;;  %v1389_v38 = vrot.slane %v1381_v44, %v4395_v55 }
 0x588   : > { %v2062_v52 = vpop.xlane.xlu1 %2061 }
 0x589   : > { %v2070_v53 = vsub.f32 %v4567_v4, %v2062_v52 }
 0x58b   : > { %v2085_v43 = vmul.f32 1.442695, %v2070_v53 }
 0x58c   : > { %v1370_v56 = vpop.permute.xlu1 %1369 }
 0x58d   : > { %3697 = vpow2.f32 %v2085_v43  ;;  %v1397_v45 = vcombine.low %v1362_v50, %v1370_v56  ;;  %v1398_v57 = vcombine.high %v1362_v50, %v1370_v56 }
 0x58f   : > { %v1405_v61 = vrot.slane %v1397_v45, %v4395_v55  ;;  %v1412_v62 = vrot.slane %v1398_v57, %v4395_v55 }
 0x591   : > { %v1413_v0 = vcombine.low %v1389_v38, %v1405_v61  ;;  %v1414_v1 = vcombine.high %v1389_v38, %v1405_v61  ;;  %v1429_v2 = vcombine.low %v1396_v58, %v1412_v62  ;;  %v1430_v3 = vcombine.high %v1396_v58, %v1412_v62 }
 0x593   : > { %v1421_v4 = vrot.slane %v1413_v0, %v4405_v63  ;;  %v1428_v7 = vrot.slane %v1414_v1, %v4405_v63  ;;  %v1437_v8 = vrot.slane %v1429_v2, %v4405_v63  ;;  %v1444_v9 = vrot.slane %v1430_v3, %v4405_v63 }
 0x595   : > { %v1517_v59 = vcombine.low %v1421_v4, %v1428_v7  ;;  %v3321_v60 = vcombine.high %v1421_v4, %v1428_v7  ;;  %v1533_v13 = vcombine.low %v1437_v8, %v1444_v9  ;;  %v3322_v14 = vcombine.high %v1437_v8, %v1444_v9 }
 0x597   : > { %v4627_v15 = vpop.eup %3697  ;;  %v1524_v16 = vrot.slane %v1517_v59, %v4395_v55  ;;  %v1532_v18 = vrot.slane %v3321_v60, %v4395_v55  ;;  %v1540_v19 = vrot.slane %v1533_v13, %v4395_v55  ;;  %v1548_v41 = vrot.slane %v3322_v14, %v4395_v55 }
 0x598   : > { %v2108_v40 = vsel %vm1670_vm3, %v4627_v15, 0.0 }
 0x599   : > { %2106 = vadd.xlane.f32.xlu0 %v2105_v20  ;;  %2109 = vadd.xlane.f32.xlu1 %v2108_v40  ;;  %v1549_v21 = vcombine.low %v1524_v16, %v1532_v18  ;;  %v1565_v36 = vcombine.low %v1540_v19, %v1548_v41  ;;  %v1550_v22 = vcombine.high %v1524_v16, %v1532_v18 }
 0x59a   : > { %v1566_v5 = vcombine.high %v1540_v19, %v1548_v41 }
 0x59b   : > { %v1557_v29 = vrot.slane %v1549_v21, %v4405_v63  ;;  %v1573_v30 = vrot.slane %v1565_v36, %v4405_v63  ;;  %v1564_v31 = vrot.slane %v1550_v22, %v4405_v63 }
 0x59c   : > { %v1580_v23 = vrot.slane %v1566_v5, %v4405_v63 }
 0x59d   : > { %v1581_v28 = vcombine.low %v1557_v29, %v1573_v30  ;;  %v1582_v11 = vcombine.high %v1557_v29, %v1573_v30 }
 0x59e   : > { %v1583_v12 = vcombine.low %v1564_v31, %v1580_v23  ;;  %v1584_v32 = vcombine.high %v1564_v31, %v1580_v23 }
 0x59f   : > { %v2135_v33 = vpack.c.bf16 %v1581_v28, %v1581_v28  ;;  %v2136_v35 = vpack.c.bf16 %v1582_v11, %v1582_v11 }
 0x5a0   : > { %v2137_v52 = vpack.c.bf16 %v1583_v12, %v1583_v12  ;;  %v2138_v44 = vpack.c.bf16 %v1584_v32, %v1584_v32 }
 0x5a1   : > { %v2148_v24 = vsel %vm2146_vm4, %v2135_v33, 0  ;;  %v2194_v26 = vsel %vm2146_vm4, %v2136_v35, 0 }
 0x5a2   : > { %3471 = vmatpush3.bf16.msra.mxu1 %v2148_v24  ;;  %3477 = vmatpush3.bf16.msra.mxu0 %v2194_v26  ;;  %v2240_v45 = vsel %vm2146_vm4, %v2137_v52, 0  ;;  %v2286_v38 = vsel %vm2146_vm4, %v2138_v44, 0 }
 0x5a3   : > { %3482 = vmatprep.subr.bf16.mxu1 %v3968_v17  ;;  %3488 = vmatprep.subr.bf16.mxu0 %v3968_v17 }
 0x5dd   : > { %v2089_v48 = vpop.xlane.xlu0 %2088 }
 0x5de   : > { %3699 = vrcp.f32 %v2089_v48  ;;  %v2092_v50 = vpop.xlane.xlu1 %2091 }
 0x5df   : > { %3701 = vrcp.f32 %v2092_v50 }
 0x5e5   : > { %v2095_v39 = vpop.xlane.xlu0 %2094 }
 0x5e6   : > { %3703 = vrcp.f32 %v2095_v39 }
 0x5e8   : > { %v3700_v46 = vpop.eup %3699 }
 0x5e9   : > { %v3702_v47 = vpop.eup %3701  ;;  %v2119_v49 = vmul.f32 %v3700_v46, %v4583_v6  ;;  %v2098_v51 = vpop.xlane.xlu1 %2097 }
 0x5ea   : > { %v2120_v53 = vmul.f32 %v3702_v47, %v4585_v42  ;;  %3705 = vrcp.f32 %v2098_v51 }
 0x5eb   : > { %v2127_v54 = vpack.c.bf16 %v2119_v49, %v2119_v49 }
 0x5ec   : > { %v2128_v43 = vpack.c.bf16 %v2120_v53, %v2120_v53 }
 0x5ed   : > { %v2101_v56 = vpop.xlane.xlu0 %2100  ;;  %3473 = vmatmul.mubr.msk.bf16.vlgmr.msra.gmra.mrb[16].mxu1 %vm1670_vm3, %v2127_v54  ;;  %v1364_v57 = vpop.permute.xlu1 %1363 }
 0x5ee   : > { %3479 = vmatmul.mubr.msk.bf16.vlgmr.msra.gmra.mrb[20].mxu0 %vm1670_vm3, %v2128_v43  ;;  %3483 = vmatpush3.bf16.msra.mxu1 %v2240_v45  ;;  %3707 = vrcp.f32 %v2101_v56 }
 0x5ef   : > { %3489 = vmatpush3.bf16.msra.mxu0 %v2286_v38  ;;  %3484 = vmatprep.mubr.msk.bf16.mxu1 %vm3969_vm2, %v3968_v17 }
 0x5f0   : > { %v3704_v6 = vpop.eup %3703  ;;  %3490 = vmatprep.mubr.msk.bf16.mxu0 %vm3969_vm2, %v3968_v17  ;;  %3494 = vmatprep.subr.bf16.mxu1 %v3968_v17 }
 0x5f1   : > { %v2121_v42 = vmul.f32 %v3704_v6, %v4591_v34  ;;  %v2104_v58 = vpop.xlane.xlu0 %2103  ;;  %v1368_v61 = vpop.permute.xlu1 %1367  ;;  %3500 = vmatprep.subr.bf16.mxu0 %v3968_v17 }
 0x5f2   : > { %3709 = vrcp.f32 %v2104_v58 }
 0x5f3   : > { %v2129_v62 = vpack.c.bf16 %v2121_v42, %v2121_v42 }
 0x5f4   : > { %v3706_v0 = vpop.eup %3705 }
 0x5f5   : > { %v2122_v1 = vmul.f32 %v3706_v0, %v4595_v37  ;;  %v1360_v2 = vpop.permute.xlu0 %1359  ;;  %3485 = vmatmul.mubr.msk.bf16.vlgmr.msra.gmra.mrb[20].mxu1 %vm1670_vm3, %v2129_v62  ;;  %v1372_v3 = vpop.permute.xlu1 %1371 }
 0x5f6   : > { %v1449_v4 = vcombine.low %v1360_v2, %v1368_v61  ;;  %v1450_v7 = vcombine.high %v1360_v2, %v1368_v61  ;;  %v1465_v8 = vcombine.low %v1364_v57, %v1372_v3  ;;  %v1466_v9 = vcombine.high %v1364_v57, %v1372_v3  ;;  %3496 = vmatprep.mubr.msk.bf16.mxu1 %vm3969_vm2, %v3968_v17 }
 0x5f7   : > { %v2130_v34 = vpack.c.bf16 %v2122_v1, %v2122_v1 }
 0x5f8   : > { %v1457_v59 = vrot.slane %v1449_v4, %v4395_v55  ;;  %v1464_v60 = vrot.slane %v1450_v7, %v4395_v55  ;;  %v1473_v13 = vrot.slane %v1465_v8, %v4395_v55  ;;  %v1480_v37 = vrot.slane %v1466_v9, %v4395_v55  ;;  %v3708_v35 = vpop.eup %3707 }
 0x5f9   : > { %3491 = vmatmul.mubr.msk.bf16.vlgmr.msra.gmra.mrb[24].mxu0 %vm1670_vm3, %v2130_v34  ;;  %v2123_v52 = vmul.f32 %v3708_v35, %v4599_v25 }
 0x5fa   : > { %v1481_v14 = vcombine.low %v1457_v59, %v1473_v13  ;;  %v1482_v16 = vcombine.high %v1457_v59, %v1473_v13  ;;  %v1497_v18 = vcombine.low %v1464_v60, %v1480_v37  ;;  %v1498_v19 = vcombine.high %v1464_v60, %v1480_v37  ;;  %3502 = vmatprep.mubr.msk.bf16.mxu0 %vm3969_vm2, %v3968_v17 }
 0x5fb   : > { %v2131_v38 = vpack.c.bf16 %v2123_v52, %v2123_v52 }
 0x5fc   : > { %v1489_v41 = vrot.slane %v1481_v14, %v4405_v63  ;;  %v1496_v20 = vrot.slane %v1482_v16, %v4405_v63  ;;  %v1505_v40 = vrot.slane %v1497_v18, %v4405_v63  ;;  %v1512_v21 = vrot.slane %v1498_v19, %v4405_v63  ;;  %v3710_v39 = vpop.eup %3709 }
 0x5fd   : > { %v2124_v53 = vmul.f32 %v3710_v39, %v4603_v27 }
 0x5fe   : > { %v1585_v36 = vcombine.low %v1489_v41, %v1496_v20  ;;  %v3323_v22 = vcombine.high %v1489_v41, %v1496_v20  ;;  %v1601_v5 = vcombine.low %v1505_v40, %v1512_v21  ;;  %v3324_v29 = vcombine.high %v1505_v40, %v1512_v21 }
 0x5ff   : > { %v2132_v6 = vpack.c.bf16 %v2124_v53, %v2124_v53 }
 0x600   : > { %v1592_v30 = vrot.slane %v1585_v36, %v4395_v55  ;;  %v1600_v31 = vrot.slane %v3323_v22, %v4395_v55  ;;  %v1608_v23 = vrot.slane %v1601_v5, %v4395_v55  ;;  %v1616_v28 = vrot.slane %v3324_v29, %v4395_v55 }
 0x602   : > { %v1617_v11 = vcombine.low %v1592_v30, %v1600_v31  ;;  %v1633_v12 = vcombine.low %v1608_v23, %v1616_v28  ;;  %v1618_v32 = vcombine.high %v1592_v30, %v1600_v31  ;;  %v1634_v33 = vcombine.high %v1608_v23, %v1616_v28 }
 0x604   : > { %v1625_v24 = vrot.slane %v1617_v11, %v4405_v63  ;;  %v1641_v26 = vrot.slane %v1633_v12, %v4405_v63  ;;  %v1632_v48 = vrot.slane %v1618_v32, %v4405_v63  ;;  %v1648_v50 = vrot.slane %v1634_v33, %v4405_v63 }
 0x606   : > { %v1649_v46 = vcombine.low %v1625_v24, %v1641_v26  ;;  %v1650_v47 = vcombine.high %v1625_v24, %v1641_v26  ;;  %v1651_v49 = vcombine.low %v1632_v48, %v1648_v50  ;;  %v1652_v51 = vcombine.high %v1632_v48, %v1648_v50 }
 0x608   : > { %v2139_v44 = vpack.c.bf16 %v1649_v46, %v1649_v46  ;;  %v2140_v54 = vpack.c.bf16 %v1650_v47, %v1650_v47  ;;  %v2141_v45 = vpack.c.bf16 %v1651_v49, %v1651_v49  ;;  %v2142_v57 = vpack.c.bf16 %v1652_v51, %v1652_v51 }
 0x60a   : > { %v2332_v43 = vsel %vm2146_vm4, %v2139_v44, 0  ;;  %v2378_v56 = vsel %vm2146_vm4, %v2140_v54, 0  ;;  %v2424_v25 = vsel %vm2146_vm4, %v2141_v45, 0  ;;  %v2470_v27 = vsel %vm2146_vm4, %v2142_v57, 0 }
 0x60b   : > { %3495 = vmatpush3.bf16.msra.mxu1 %v2332_v43  ;;  %3501 = vmatpush3.bf16.msra.mxu0 %v2378_v56 }
 0x60c   : > { %3506 = vmatprep.subr.bf16.mxu1 %v3968_v17  ;;  %3512 = vmatprep.subr.bf16.mxu0 %v3968_v17 }
 0x60e   : > { %3497 = vmatmul.mubr.msk.bf16.vlgmr.msra.gmra.mrb[24].mxu1 %vm1670_vm3, %v2131_v38  ;;  %3503 = vmatmul.mubr.msk.bf16.vlgmr.msra.gmra.mrb[28].mxu0 %vm1670_vm3, %v2132_v6 }
 0x60f   : > { %3507 = vmatpush3.bf16.msra.mxu1 %v2424_v25  ;;  %3513 = vmatpush3.bf16.msra.mxu0 %v2470_v27 }
 0x610   : > { %3508 = vmatprep.mubr.msk.bf16.mxu1 %vm3969_vm2, %v3968_v17  ;;  %3514 = vmatprep.mubr.msk.bf16.mxu0 %vm3969_vm2, %v3968_v17 }
 0x611   : > { %3518 = vmatprep.subr.bf16.mxu1 %v3968_v17  ;;  %3526 = vmatprep.subr.bf16.mxu0 %v3968_v17 }
 0x626   : > { %v2107_v42 = vpop.xlane.xlu0 %2106  ;;  %v2110_v58 = vpop.xlane.xlu1 %2109 }
 0x627   : > { %3711 = vrcp.f32 %v2107_v42 }
 0x628   : > { %3713 = vrcp.f32 %v2110_v58 }
 0x631   : > { %v3712_v61 = vpop.eup %3711 }
 0x632   : > { %v3714_v62 = vpop.eup %3713  ;;  %v2125_v0 = vmul.f32 %v3712_v61, %v4625_v10 }
 0x633   : > { %v2126_v1 = vmul.f32 %v3714_v62, %v4627_v15 }
 0x634   : > { %v2133_v2 = vpack.c.bf16 %v2125_v0, %v2125_v0 }
 0x635   : > { %v2134_v3 = vpack.c.bf16 %v2126_v1, %v2126_v1 }
 0x636   : > { %3509 = vmatmul.mubr.msk.bf16.vlgmr.msra.gmra.mrb[28].mxu1 %vm1670_vm3, %v2133_v2 }
 0x637   : > { %3515 = vmatmul.mubr.msk.bf16.vlgmr.msra.gmra.mrb[32].mxu0 %vm1670_vm3, %v2134_v3  ;;  %3522 = vmatprep.mubr.msk.bf16.mxu1 %vm3969_vm2, %v3968_v17 }
 0x638   : > { %3530 = vmatprep.mubr.msk.bf16.mxu0 %vm3969_vm2, %v3968_v17 }
 0x6c0   : > { %v2184_v4 = vpop.f32.mrb[16].mxu1 }
 0x6c1   : > { %v2230_v7 = vpop.f32.mrb[20].mxu0  ;;  %v3474_v8 = vpop.f32.mrb[17].mxu1 }
 0x6c2   : > { %v3480_v9 = vpop.f32.mrb[21].mxu0  ;;  %v2187_v34 = vpop.f32.mrb[18].mxu1 }
 0x6c3   : > { %v2233_v10 = vpop.f32.mrb[22].mxu0  ;;  %v3475_v59 = vpop.f32.mrb[19].mxu1 }
 0x6c4   : > { %v3481_v15 = vpop.f32.mrb[23].mxu0 }
 0x6c8   : > { %v2276_v60 = vpop.f32.mrb[20].mxu1 }
 0x6c9   : > { %v2512_v13 = vcombine.low %v2184_v4, %v2276_v60  ;;  %v2513_v37 = vcombine.high %v2184_v4, %v2276_v60  ;;  %v3486_v14 = vpop.f32.mrb[21].mxu1 }
 0x6ca   : > { %v2279_v16 = vpop.f32.mrb[22].mxu1 }
 0x6cb   : > { %v3487_v18 = vpop.f32.mrb[23].mxu1  ;;  %v2520_v36 = vrot.slane %v2512_v13, %v4395_v55  ;;  %v2527_v22 = vrot.slane %v2513_v37, %v4395_v55 }
 0x6cc   : > { %v2322_v19 = vpop.f32.mrb[24].mxu0 }
 0x6cd   : > { %v2528_v41 = vcombine.low %v2230_v7, %v2322_v19  ;;  %v2529_v20 = vcombine.high %v2230_v7, %v2322_v19  ;;  %v3492_v40 = vpop.f32.mrb[25].mxu0 }
 0x6ce   : > { %v2325_v21 = vpop.f32.mrb[26].mxu0 }
 0x6cf   : > { %v2536_v5 = vrot.slane %v2528_v41, %v4395_v55  ;;  %v2543_v29 = vrot.slane %v2529_v20, %v4395_v55  ;;  %v3493_v30 = vpop.f32.mrb[27].mxu0 }
 0x6d1   : > { %v2544_v31 = vcombine.low %v2520_v36, %v2536_v5  ;;  %v2545_v23 = vcombine.high %v2520_v36, %v2536_v5  ;;  %v2560_v28 = vcombine.low %v2527_v22, %v2543_v29  ;;  %v2561_v11 = vcombine.high %v2527_v22, %v2543_v29 }
 0x6d3   : > { %v2552_v12 = vrot.slane %v2544_v31, %v4405_v63  ;;  %v2559_v32 = vrot.slane %v2545_v23, %v4405_v63  ;;  %v2568_v33 = vrot.slane %v2560_v28, %v4405_v63  ;;  %v2575_v35 = vrot.slane %v2561_v11, %v4405_v63  ;;  %v3671_v11 = vld [vmem:[%s4315_s20] sm:$0xff]  }
 0x6d4   : > { %3519 = vmatpush3.bf16.msra.mxu1 %v3671_v11 }
 0x6d5   : > { %v2648_v24 = vcombine.low %v2552_v12, %v2559_v32  ;;  %v3341_v26 = vcombine.high %v2552_v12, %v2559_v32  ;;  %v2664_v48 = vcombine.low %v2568_v33, %v2575_v35  ;;  %v3342_v50 = vcombine.high %v2568_v33, %v2575_v35  ;;  %3520 = vmatprep.subr.bf16.mxu1 %v3968_v17 }
 0x6d7   : > { %v2655_v39 = vrot.slane %v2648_v24, %v4395_v55  ;;  %v2663_v46 = vrot.slane %v3341_v26, %v4395_v55  ;;  %v2671_v47 = vrot.slane %v2664_v48, %v4395_v55  ;;  %v2679_v49 = vrot.slane %v3342_v50, %v4395_v55 }
 0x6d9   : > { %v2681_v51 = vcombine.high %v2655_v39, %v2663_v46  ;;  %v2697_v52 = vcombine.high %v2671_v47, %v2679_v49  ;;  %v2680_v53 = vcombine.low %v2655_v39, %v2663_v46  ;;  %v2696_v44 = vcombine.low %v2671_v47, %v2679_v49  ;;  %v3672_v39 = vld [vmem:[%s4315_s20 + $0x8] sm:$0xff]   ;;  %s3978_s20 = smov 8  }
 0x6da   : > { %3521 = vmatpush3.bf16.msra.mxu1 %v3672_v39 }
 0x6db   : > { %v4718_v54 = vrot.slane %v2681_v51, %v4405_v63  ;;  %v4721_v43 = vrot.slane %v2697_v52, %v4405_v63  ;;  %v4724_v56 = vrot.slane %v2680_v53, %v4405_v63  ;;  %v4727_v45 = vrot.slane %v2696_v44, %v4405_v63  ;;  %3534 = vmatprep.subr.bf16.mxu1 %v3968_v17 }
 0x6dd   : > { %v2714_v57 = vcombine.low %v4718_v54, %v4721_v43  ;;  %v2712_v38 = vcombine.low %v4724_v56, %v4727_v45  ;;  %v2713_v6 = vcombine.high %v4724_v56, %v4727_v45  ;;  %v2715_v25 = vcombine.high %v4718_v54, %v4721_v43  ;;  %v3723_v45 = vld [vmem:[#allocation10] sm:$0xff] }
 0x6e1   : > { %v2368_v27 = vpop.f32.mrb[24].mxu1  ;;  %v2414_v42 = vpop.f32.mrb[28].mxu0 }
 0x6e2   : > { %v3498_v58 = vpop.f32.mrb[25].mxu1  ;;  %v3504_v61 = vpop.f32.mrb[29].mxu0 }
 0x6e3   : > { %v2371_v62 = vpop.f32.mrb[26].mxu1  ;;  %v2417_v0 = vpop.f32.mrb[30].mxu0 }
 0x6e4   : > { %v3499_v1 = vpop.f32.mrb[27].mxu1  ;;  %v3505_v2 = vpop.f32.mrb[31].mxu0 }
 0x709   : > { %v2460_v3 = vpop.f32.mrb[28].mxu1 }
 0x70a   : > { %v2580_v4 = vcombine.low %v2368_v27, %v2460_v3  ;;  %v2581_v7 = vcombine.high %v2368_v27, %v2460_v3  ;;  %v2506_v8 = vpop.f32.mrb[32].mxu0  ;;  %v3510_v9 = vpop.f32.mrb[29].mxu1 }
 0x70b   : > { %v2596_v34 = vcombine.low %v2414_v42, %v2506_v8  ;;  %v2597_v10 = vcombine.high %v2414_v42, %v2506_v8  ;;  %v3516_v59 = vpop.f32.mrb[33].mxu0  ;;  %v2463_v15 = vpop.f32.mrb[30].mxu1 }
 0x70c   : > { %v2588_v60 = vrot.slane %v2580_v4, %v4395_v55  ;;  %v2595_v13 = vrot.slane %v2581_v7, %v4395_v55  ;;  %v2509_v37 = vpop.f32.mrb[34].mxu0  ;;  %v3511_v14 = vpop.f32.mrb[31].mxu1  ;;  %v3724_v59 = vld [vmem:[#allocation10 + $0x8] sm:$0xff] }
 0x70d   : > { %v2604_v16 = vrot.slane %v2596_v34, %v4395_v55  ;;  %v2611_v18 = vrot.slane %v2597_v10, %v4395_v55  ;;  %v3517_v19 = vpop.f32.mrb[35].mxu0 }
 0x70f   : > { %v2612_v41 = vcombine.low %v2588_v60, %v2604_v16  ;;  %v2613_v20 = vcombine.high %v2588_v60, %v2604_v16  ;;  %v2628_v40 = vcombine.low %v2595_v13, %v2611_v18  ;;  %v2629_v21 = vcombine.high %v2595_v13, %v2611_v18 }
 0x711   : > { %v2620_v36 = vrot.slane %v2612_v41, %v4405_v63  ;;  %v2627_v22 = vrot.slane %v2613_v20, %v4405_v63  ;;  %v2636_v5 = vrot.slane %v2628_v40, %v4405_v63  ;;  %v2643_v29 = vrot.slane %v2629_v21, %v4405_v63 }
 0x713   : > { %v2716_v30 = vcombine.low %v2620_v36, %v2627_v22  ;;  %v3343_v31 = vcombine.high %v2620_v36, %v2627_v22  ;;  %v2732_v23 = vcombine.low %v2636_v5, %v2643_v29  ;;  %v3344_v28 = vcombine.high %v2636_v5, %v2643_v29  ;;  %v3673_v5 = vld [vmem:[%s4320_s29] sm:$0xff]   ;;  %v3674_v29 = vld [vmem:[%s4320_s29 + $0x8] sm:$0xff]   ;;  %s3980_s29 = smov [#allocation10]  }
 0x714   : > { %3527 = vmatpush3.bf16.msra.mxu0 %v3673_v5 }
 0x715   : > { %v2723_v12 = vrot.slane %v2716_v30, %v4395_v55  ;;  %v2731_v32 = vrot.slane %v3343_v31, %v4395_v55  ;;  %v2739_v33 = vrot.slane %v2732_v23, %v4395_v55  ;;  %v2747_v35 = vrot.slane %v3344_v28, %v4395_v55  ;;  %3528 = vmatprep.subr.bf16.mxu0 %v3968_v17 }
 0x717   : > { %v2749_v24 = vcombine.high %v2723_v12, %v2731_v32  ;;  %v2765_v26 = vcombine.high %v2739_v33, %v2747_v35  ;;  %v2748_v48 = vcombine.low %v2723_v12, %v2731_v32  ;;  %v2764_v50 = vcombine.low %v2739_v33, %v2747_v35  ;;  %v3348_v35 = vld [vmem:[%s4914_s23] ss:$0 sm:$0xff] }
 0x718   : > { %3529 = vmatpush3.bf16.msra.mxu0 %v3674_v29 }
 0x719   : > { %v2763_v46 = vrot.slane %v2749_v24, %v4405_v63  ;;  %v2779_v47 = vrot.slane %v2765_v26, %v4405_v63  ;;  %v2756_v49 = vrot.slane %v2748_v48, %v4405_v63  ;;  %v2772_v51 = vrot.slane %v2764_v50, %v4405_v63  ;;  %v3349_v50 = vld [vmem:[%s539_s21] ss:$0 sm:$0xff] }
 0x71b   : > { %v2782_v55 = vcombine.low %v2763_v46, %v2779_v47  ;;  %v2781_v52 = vcombine.high %v2756_v49, %v2772_v51  ;;  %v2780_v53 = vcombine.low %v2756_v49, %v2772_v51  ;;  %v2783_v44 = vcombine.high %v2763_v46, %v2779_v47  ;;  %v3675_v51 = vld [vmem:[%s4325_s19] sm:$0xff]  }
 0x71d   : > { %v3659_v54 = vpack.i.bf16 %v2782_v55, %v2714_v57  ;;  %v3654_v43 = vpack.i.bf16 %v2781_v52, %v2713_v6  ;;  %v3664_v27 = vpack.i.bf16 %v2783_v44, %v2715_v25  ;;  %v3676_v55 = vld [vmem:[%s4325_s19 + $0x8] sm:$0xff]   ;;  %v3677_v52 = vld [vmem:[%s4325_s19 + $0x10] sm:$0xff]   ;;  %v3350_v44 = vld [vmem:[%s547_s1] ss:$0 sm:$0xff] }
 0x71f   : > { %3660 = vrot.lane.b32.xlu1 %v3659_v54, %s3977_s6  ;;  %3655 = vrot.lane.b32.xlu0 %v3654_v43, %s3978_s20 }
 0x723   : > { %3665 = vrot.lane.b32.xlu0 %v3664_v27, %s3979_s10 }
 0x791   : > { %v3661_v42 = vpop.permute.xlu1 %3660  ;;  %v3656_v58 = vpop.permute.xlu0 %3655 }
 0x792   : > { %v3658_v63 = vunpack.i.h.bf16 %v3656_v58  ;;  %v3657_v61 = vunpack.i.l.bf16 %v3656_v58  ;;  %v3663_v62 = vunpack.i.h.bf16 %v3661_v42  ;;  %v3662_v0 = vunpack.i.l.bf16 %v3661_v42 }
 0x794   : > { %v2808_v57 = vsel %vm1670_vm3, %v2712_v38, %v3657_v61  ;;  %v2809_v6 = vsel %vm1670_vm3, %v2780_v53, %v3658_v63  ;;  %v3678_v53 = vld [vmem:[%s4325_s19 + $0x18] sm:$0xff]   ;;  %s3097_s19 = sshll.u32 %s3980_s29, 4  ;;  %s3098_s19 = int_to_ptr.vmem [resolvable:$true] %s3097_s19 }
 0x795   : > { %v3666_v25 = vpop.permute.xlu0 %3665  ;;  %v2811_v3 = vsel %vm2810_vm5, %v2808_v57, %v3662_v0  ;;  %v2812_v4 = vsel %vm2810_vm5, %v2809_v6, %v3663_v62  ;;  %s3871_s8 = scalar_lea.vmem %s3098_s19, 256  ;;  %p3878_p6 = scmp.lt.s32.totalorder %s3098_s19, %s3098_s19 }
 0x796   : > { %v3668_v1 = vunpack.i.h.bf16 %v3666_v25  ;;  %v3667_v2 = vunpack.i.l.bf16 %v3666_v25  ;;  %p3872_p4 = scmp.ne.s32.totalorder %s3098_s19, %s3871_s8  ;;  %p3879_p13 = scmp.lt.s32.totalorder %s3871_s8, %s3871_s8 }
 0x798   : > { %v2814_v7 = vsel %vm2813_vm6, %v2811_v3, %v3667_v2  ;;  %v2815_v8 = vsel %vm2813_vm6, %v2812_v4, %v3668_v1  ;;  %p3873_p11 = pnand %p3872_p4, %p3586_p5  ;;  %p3880_p10 = por %p3879_p13, %p3878_p6 }
 0x799   : > { %v2816_v9 = vpack.c.bf16 %v2815_v8, %v2814_v7  ;;  %v3354_v7 = vld [vmem:[%s648_s12] ss:$0 sm:$0xff] }
 0x79a   : > { %p3874_p9 = pneg %p3873_p11 }
 0x79b   : > { %3523 = vmatmul.mubr.msk.bf16.vlgmr.msra.gmra.mrb[32].mxu1 %vm664_vm1, %v2816_v9 }
 0x79c   : > { %3542 = vmatprep.mubr.msk.bf16.mxu1 %vm3969_vm2, %v3968_v17  ;;  %3535 = vmatpush3.bf16.msra.mxu1 %v3675_v51  ;;  %p3881_p1 = pnand %p3880_p10, %p3874_p9 }
 0x79d   : > { %3536 = vmatprep.subr.bf16.mxu1 %v3968_v17 }
 0x7a0   : > { %3537 = vmatpush3.bf16.msra.mxu1 %v3676_v55 }
 0x7a1   : > { %3538 = vmatprep.subr.bf16.mxu1 %v3968_v17 }
 0x7a4   : > { %3539 = vmatpush3.bf16.msra.mxu1 %v3677_v52 }
 0x7a5   : > { %3540 = vmatprep.subr.bf16.mxu1 %v3968_v17 }
 0x7a8   : > { %3541 = vmatpush3.bf16.msra.mxu1 %v3678_v53 }
 0x86e   : > { %v2870_v56 = vpop.f32.mrb[32].mxu1 }
 0x86f   : > { %v4766_v38 = vadd.f32 %v3723_v45, %v2870_v56  ;;  %v3524_v34 = vpop.f32.mrb[33].mxu1 }
 0x870   : > { %v2873_v10 = vpop.f32.mrb[34].mxu1 }
 0x871   : > { %v4768_v15 = vadd.f32 %v3724_v59, %v2873_v10  ;;  %v3525_v60 = vpop.f32.mrb[35].mxu1  ;;  %v2879_v13 = vsel %vm664_vm1, %v4766_v38, 0.0 }
 0x872   : > { %2880 = vadd.xlane.f32.xlu1 %v2879_v13 }
 0x873   : > { %v2882_v37 = vsel %vm664_vm1, %v4768_v15, 0.0 }
 0x874   : > { %2883 = vadd.xlane.f32.xlu0 %v2882_v37 }
 0x8ff   : > { %v2881_v14 = vpop.xlane.xlu1 %2880 }
 0x900   : > { %v2885_v16 = vmul.f32 0.03125, %v2881_v14 }
 0x901   : > { %v2884_v18 = vpop.xlane.xlu0 %2883 }
 0x902   : > { %v2887_v19 = vsub.f32 %v4766_v38, %v2885_v16  ;;  %v2886_v41 = vmul.f32 0.03125, %v2884_v18 }
 0x904   : > { %v2888_v20 = vsub.f32 %v4768_v15, %v2886_v41  ;;  %v2889_v40 = vmul.f32 %v2887_v19, %v2887_v19 }
 0x906   : > { %v2891_v21 = vsel %vm664_vm1, %v2889_v40, 0.0  ;;  %v2890_v36 = vmul.f32 %v2888_v20, %v2888_v20 }
 0x907   : > { %2892 = vadd.xlane.f32.xlu0 %v2891_v21 }
 0x908   : > { %v2894_v22 = vsel %vm664_vm1, %v2890_v36, 0.0 }
 0x90b   : > { %2895 = vadd.xlane.f32.xlu0 %v2894_v22 }
 0x994   : > { %v2893_v30 = vpop.xlane.xlu0 %2892 }
 0x995   : > { %v2897_v31 = vmul.f32 0.03125, %v2893_v30 }
 0x997   : > { %v2899_v23 = vadd.f32 1e-05, %v2897_v31 }
 0x998   : > { %v2896_v28 = vpop.xlane.xlu0 %2895 }
 0x999   : > { %3715 = vrsqrt.f32 %v2899_v23  ;;  %v2898_v11 = vmul.f32 0.03125, %v2896_v28 }
 0x99b   : > { %v2900_v12 = vadd.f32 1e-05, %v2898_v11 }
 0x99d   : > { %3717 = vrsqrt.f32 %v2900_v12 }
 0x9a3   : > { %v3716_v32 = vpop.eup %3715 }
 0x9a4   : > { %v2903_v33 = vmul.f32 %v3716_v32, %v2887_v19 }
 0x9a6   : > { %v2911_v26 = vmul.f32 %v3348_v35, %v2903_v33 }
 0x9a7   : > { %v3718_v24 = vpop.eup %3717 }
 0x9a8   : > { %v2904_v48 = vmul.f32 %v3718_v24, %v2888_v20  ;;  %v2919_v46 = vadd.f32 %v3349_v50, %v2911_v26 }
 0x9aa   : > { %v2912_v39 = vmul.f32 %v3348_v35, %v2904_v48 }
 0x9ac   : > { %v2920_v47 = vadd.f32 %v3349_v50, %v2912_v39 }
 0x9ae   : > { %v2921_v49 = vpack.c.bf16 %v2920_v47, %v2919_v46 }
 0x9b0   : > { %3531 = vmatmul.mubr.msk.bf16.vlgmr.msra.gmra.mrb[36].mxu0 %vm664_vm1, %v2921_v49 }
 0xa83   : > { %v2982_v54 = vpop.f32.mrb[36].mxu0 }
 0xa84   : > { %v2983_v43 = vadd.f32 %v3350_v44, %v2982_v54  ;;  %v3532_v27 = vpop.f32.mrb[37].mxu0 }
 0xa85   : > { %v2985_v42 = vpop.f32.mrb[38].mxu0 }
 0xa86   : > { %v2991_v58 = vmul.f32 0.70710677, %v2983_v43  ;;  %v2986_v63 = vadd.f32 %v3350_v44, %v2985_v42  ;;  %v3533_v61 = vpop.f32.mrb[39].mxu0  ;;  %v2989_v25 = vmul.f32 0.5, %v2983_v43 }
 0xa88   : > { %3719 = verf.f32 %v2991_v58  ;;  %v2992_v62 = vmul.f32 0.70710677, %v2986_v63  ;;  %v2990_v17 = vmul.f32 0.5, %v2986_v63 }
 0xa8a   : > { %3721 = verf.f32 %v2992_v62 }
 0xa92   : > { %v3720_v0 = vpop.eup %3719 }
 0xa93   : > { %v2995_v57 = vadd.f32 1.0, %v3720_v0 }
 0xa94   : > { %v3722_v6 = vpop.eup %3721 }
 0xa95   : > { %v2996_v1 = vadd.f32 1.0, %v3722_v6  ;;  %v2997_v2 = vmul.f32 %v2995_v57, %v2989_v25 }
 0xa97   : > { %v2998_v3 = vmul.f32 %v2996_v1, %v2990_v17 }
 0xa99   : > { %v2999_v4 = vpack.c.bf16 %v2998_v3, %v2997_v2 }
 0xa9b   : > { %3543 = vmatmul.mubr.msk.bf16.vlgmr.msra.gmra.mrb[36].mxu1 %vm3039_vm7, %v2999_v4 }
 0xb6e   : > { %v3077_v8 = vpop.f32.mrb[36].mxu1 }
 0xb6f   : > { %v3078_v9 = vadd.f32 %v3354_v7, %v3077_v8  ;;  %v3544_v56 = vpop.f32.mrb[37].mxu1 }
 0xb70   : > { %v3080_v45 = vpop.f32.mrb[38].mxu1 }
 0xb71   : > { %v3084_v34 = vadd.f32 %v3078_v9, %v4766_v38  ;;  %v3081_v10 = vadd.f32 %v3354_v7, %v3080_v45  ;;  %v3545_v59 = vpop.f32.mrb[39].mxu1 }
 0xb73   : > { %3086 = vst.msk [vmem:[#allocation10] sm:$0xff] %vm664_vm1, %v3084_v34  ;;  %v3085_v60 = vadd.f32 %v3081_v10, %v4768_v15 }
 0xb75   : > { %3087 = vst.msk [vmem:[#allocation10 + $0x8] sm:$0xff] %vm664_vm1, %v3085_v60 }
 0xb76   : > { %3884 = shalt.err (!%p3881_p1)
}
 0xb77   : > { %s4916_s24 = sld [smem:[#allocation26_spill]] }
 0xb7d   : > { %s4917_s17 = smov %s4916_s24  ;;  %s3885_s28 = scalar_lea.hbm %s4916_s24, 256 }
 0xb7e   : > { %p3886_p3 = scmp.ne.s32.totalorder %s4917_s17, %s3885_s28  ;;  %p3891_p8 = scmp.lt.u32.totalorder %s3885_s28, %s4917_s17 }
 0xb80   : > { %p3887_p7 = pnand %p3886_p3, %p3586_p5 }
 0xb82   : > { %p3888_p0 = pneg %p3887_p7 }
 0xb84   : > { %p3893_p12 = pnand %p3891_p8, %p3888_p0 }
 0xb86   : > { %3896 = shalt.err (!%p3893_p12)
}
 0xb87   : > { %s3981_s14 = smov 128  }
 0xb88   : > { %3561 = dma.vmem_to_hbm [thread:$0]  (%p3586_p5), %s3098_s19, 256, %s4917_s17, [#allocation4], %s3981_s14, %s3981_s14, %s3978_s20  }
 0xb89   : > { %3934 = dma.done.wait (%p3586_p5), [#allocation4], 256  }
 0xb8a   : > { %3936 = vsyncadd (%p3586_p5), [#allocation4], 4294967040 }
 0xb8b PF: > { %s4918_s0 = sld [smem:[#allocation17_spill]]  ;;  %s4919_s6 = sld [smem:[#allocation15_spill]] }
 0xb8c   : > { %s4920_s23 = sld [smem:[#allocation19_spill]]  ;;  %s4921_s24 = sld [smem:[#allocation16_spill]] }
 0xb8d   : > { %s4922_s25 = sld [smem:[#allocation18_spill]]  ;;  %s4923_s21 = smov %s3943_s22 }
 0xb91   : > { %s25_s26 = sadd.s32 1, %s4918_s0   ;;  %s4924_s22 = smov %s4919_s6 }
 0xb92   : > { %p22_p2 = scmp.ge.s32.totalorder %s25_s26, 4  }
 0xb94   :  { %24 = sbr.rel (!%p22_p2) target bundleno = 13 (0xd), region = 161 }
 0xb9b   :  { %3113 = vsyncpa [#allocation3], 1 }
 0xb9c   :  { %3115 = vsyncpa [#allocation3 + $0x1], 1 }
 0xb9d   :  { %3116 = vsyncpa [#allocation6], 1 }
 0xb9e   :  { %3117 = vsyncpa [#allocation4], 1 }
 0xb9f   :  { %3119 = vsyncpa [#allocation4 + $0x1], 1 }

</bundles_post_ra>
